<compile_context>
chip_gen: v7x
topology: tpu7x:2x2x1
jax: 0.10.0
libtpu: 0.0.40
codegen_flags: <defaults>
</compile_context>

<pallas_src>
import functools
import math

import jax
import jax.numpy as jnp
from jax.experimental import pallas as pl
from jax.experimental.pallas import tpu as pltpu


# ----------------------------------------------------------------------------
# Per-generation VMEM budget and tile selection
# ----------------------------------------------------------------------------

@functools.lru_cache(maxsize=None)
def _vmem_limit_bytes():
    """~3/4 of physical VMEM: ~96 MiB on v5e/v6e, ~48 MiB on v7x."""
    cap = None
    try:
        info = pltpu.get_tpu_info()
        for name in ("vmem_capacity_bytes", "vmem_bytes", "vmem_size_bytes"):
            cap = getattr(info, name, None)
            if cap:
                break
    except Exception:
        cap = None
    if not cap:
        cap = 64 * 1024 * 1024          # conservative fallback (v7x physical)
    return min(int(cap) * 3 // 4, 100 * 1024 * 1024)


def _tile_budget():
    # Leave headroom for semaphores / compiler-internal scratch.
    return (_vmem_limit_bytes() * 85) // 100


def _round_up(x, m):
    return ((x + m - 1) // m) * m


def _divisor_tiles(dim, cands):
    """Candidates (descending) that evenly divide `dim`, plus `dim` itself."""
    tiles = {c for c in cands if c <= dim and dim % c == 0}
    tiles.add(dim)
    return sorted(tiles, reverse=True)


def _ln_matmul_tiles(M, K, N, out_itemsize, budget):
    """Largest (tm, tn) — tm prioritized to cut weight re-streaming — that fit."""
    tms = _divisor_tiles(M, (1024, 512, 256, 128, 64, 32, 16, 8))
    tns = _divisor_tiles(N, (1024, 512, 256, 128))
    for tm in tms:
        for tn in tns:
            vmem = (2 * tm * K * 4                 # x tile (f32), double-buffered
                    + tm * K * 2                   # cached LayerNorm output (bf16)
                    + 2 * K * tn * 2               # weight tile (bf16), double-buffered
                    + 2 * tm * tn * out_itemsize   # output tile, double-buffered
                    + 4 * K * 4 + 2 * tn * 4)      # gamma / beta / bias
            if vmem <= budget:
                return tm, tn
    return tms[-1], tns[-1]


def _matmul_tiles(M, K, N, x_itemsize, out_itemsize, budget):
    tms = _divisor_tiles(M, (1024, 512, 256, 128, 64, 32, 16, 8))
    tns = _divisor_tiles(N, (1024, 512, 256, 128))
    tks = _divisor_tiles(K, (2048, 1024, 512, 256, 128))
    for tm in tms:
        for tn in tns:
            for tk in tks:
                vmem = (2 * tm * tn * 4                # residual tile (f32)
                        + 2 * tm * tk * x_itemsize     # activation tile
                        + 2 * tk * tn * 2              # weight tile (bf16)
                        + 2 * tm * tn * out_itemsize   # output tile
                        + tm * tn * 4                  # f32 accumulator scratch
                        + 2 * tn * 4)                  # bias
                if vmem <= budget:
                    return tm, tn, tk
    return tms[-1], tns[-1], tks[-1]


# ----------------------------------------------------------------------------
# Fused LayerNorm + matmul (+ optional GELU); LN cached once per M-tile
# ----------------------------------------------------------------------------

def _ln_matmul_kernel(x_ref, g_ref, b_ref, w_ref, bias_ref, o_ref, xn_ref, *,
                      eps, activation):
    # LayerNorm + affine + bf16 cast computed once per M-tile (j == 0) and
    # cached in VMEM scratch; reused for every N-tile.
    @pl.when(pl.program_id(1) == 0)
    def _compute_ln():
        x = x_ref[...].astype(jnp.float32)
        mean = jnp.mean(x, axis=-1, keepdims=True)
        var = jnp.mean(jnp.square(x - mean), axis=-1, keepdims=True)
        xn = (x - mean) * jax.lax.rsqrt(var + eps)
        xn = xn * g_ref[...] + b_ref[...]
        xn_ref[...] = xn.astype(jnp.bfloat16)

    # bf16 MXU inputs, f32 accumulation.
    y = jnp.dot(xn_ref[...], w_ref[...], preferred_element_type=jnp.float32)
    y = y + bias_ref[...]
    if activation == "gelu":
        y = jax.nn.gelu(y, approximate=True)
    o_ref[...] = y.astype(o_ref.dtype)


def ln_matmul(x, gamma, beta, w, bias, *, activation="none",
              out_dtype=jnp.float32, eps=1e-5):
    """out = act(LayerNorm(x) @ w + bias); w is (K, N) bf16 (pre-transposed)."""
    M, K = x.shape
    N = w.shape[1]
    out_itemsize = jnp.dtype(out_dtype).itemsize
    tm, tn = _ln_matmul_tiles(M, K, N, out_itemsize, _tile_budget())
    grid = (M // tm, N // tn)
    kern = functools.partial(_ln_matmul_kernel, eps=eps, activation=activation)
    cost = pl.CostEstimate(
        flops=2 * M * N * K + 8 * M * K,
        transcendentals=(M * N if activation == "gelu" else 0),
        bytes_accessed=(int(x.size) * x.dtype.itemsize
                        + int(w.size) * w.dtype.itemsize
                        + M * N * out_itemsize))
    return pl.pallas_call(
        kern,
        out_shape=jax.ShapeDtypeStruct((M, N), out_dtype),
        grid=grid,
        in_specs=[
            pl.BlockSpec((tm, K), lambda i, j: (i, 0)),   # full K (LN needs it)
            pl.BlockSpec((1, K), lambda i, j: (0, 0)),
            pl.BlockSpec((1, K), lambda i, j: (0, 0)),
            pl.BlockSpec((K, tn), lambda i, j: (0, j)),
            pl.BlockSpec((1, tn), lambda i, j: (0, j)),
        ],
        out_specs=pl.BlockSpec((tm, tn), lambda i, j: (i, j)),
        scratch_shapes=[pltpu.VMEM((tm, K), jnp.bfloat16)],   # cached LN output
        compiler_params=pltpu.CompilerParams(
            # j must be "arbitrary": the j==0 LN compute feeds later j steps.
            dimension_semantics=("parallel", "arbitrary"),
            vmem_limit_bytes=_vmem_limit_bytes()),
        cost_estimate=cost,
    )(x, gamma.reshape(1, K), beta.reshape(1, K), w, bias.reshape(1, N))


# ----------------------------------------------------------------------------
# Matmul with K-axis accumulator, fused bias + residual add (aliased output)
# ----------------------------------------------------------------------------

def _matmul_residual_kernel(res_ref, x_ref, w_ref, bias_ref, o_ref, acc_ref):
    @pl.when(pl.program_id(2) == 0)
    def _init():
        acc_ref[...] = jnp.zeros_like(acc_ref)

    acc_ref[...] += jnp.dot(x_ref[...].astype(jnp.bfloat16), w_ref[...],
                            preferred_element_type=jnp.float32)

    @pl.when(pl.program_id(2) == pl.num_programs(2) - 1)
    def _finalize():
        o_ref[...] = (res_ref[...].astype(jnp.float32) + acc_ref[...]
                      + bias_ref[...]).astype(o_ref.dtype)


def matmul_residual(res, x, w, bias):
    """out = res + x @ w + bias; `res` is aliased into the output buffer."""
    M, K = x.shape
    N = w.shape[1]
    tm, tn, tk = _matmul_tiles(M, K, N, x.dtype.itemsize, res.dtype.itemsize,
                               _tile_budget())
    grid = (M // tm, N // tn, K // tk)
    cost = pl.CostEstimate(
        flops=2 * M * N * K,
        transcendentals=0,
        bytes_accessed=(int(x.size) * x.dtype.itemsize
                        + int(w.size) * w.dtype.itemsize
                        + 2 * int(res.size) * res.dtype.itemsize))
    return pl.pallas_call(
        _matmul_residual_kernel,
        out_shape=jax.ShapeDtypeStruct((M, N), res.dtype),
        grid=grid,
        in_specs=[
            pl.BlockSpec((tm, tn), lambda i, j, k: (i, j)),   # residual
            pl.BlockSpec((tm, tk), lambda i, j, k: (i, k)),   # activation
            pl.BlockSpec((tk, tn), lambda i, j, k: (k, j)),   # weight (bf16)
            pl.BlockSpec((1, tn), lambda i, j, k: (0, j)),    # bias
        ],
        out_specs=pl.BlockSpec((tm, tn), lambda i, j, k: (i, j)),
        scratch_shapes=[pltpu.VMEM((tm, tn), jnp.float32)],
        input_output_aliases={0: 0},
        compiler_params=pltpu.CompilerParams(
            dimension_semantics=("parallel", "parallel", "arbitrary"),
            vmem_limit_bytes=_vmem_limit_bytes()),
        cost_estimate=cost,
    )(res, x, w, bias.reshape(1, N))


# ----------------------------------------------------------------------------
# Flash-style causal attention: grid over (head, q-block); key blocks are an
# in-kernel loop that stops at the causal diagonal.  K/V for a head are DMA'd
# into VMEM once (index_map is constant across query blocks).
# ----------------------------------------------------------------------------

def _flash_attention_kernel(q_ref, k_ref, v_ref, o_ref, m_sc, l_sc, acc_sc, *,
                            tq, tk):
    qi = pl.program_id(1)

    m_sc[...] = jnp.full_like(m_sc, -1e30)
    l_sc[...] = jnp.zeros_like(l_sc)
    acc_sc[...] = jnp.zeros_like(acc_sc)

    q = q_ref[...]                     # (tq, Dh) bf16; 1/sqrt(Dh) folded into Wq

    def _update(s, v_blk):
        m_prev = m_sc[...]
        m_new = jnp.maximum(m_prev, jnp.max(s, axis=-1, keepdims=True))
        alpha = jnp.exp(m_prev - m_new)
        p = jnp.exp(s - m_new)
        l_sc[...] = alpha * l_sc[...] + jnp.sum(p, axis=-1, keepdims=True)
        acc_sc[...] = alpha * acc_sc[...] + jnp.dot(
            p.astype(jnp.bfloat16), v_blk, preferred_element_type=jnp.float32)
        m_sc[...] = m_new

    def _scores(start):
        k_blk = k_ref[pl.ds(start, tk), :]
        v_blk = v_ref[pl.ds(start, tk), :]
        # No k.T: contract the last dims directly on the MXU.
        s = jax.lax.dot_general(q, k_blk, (((1,), (1,)), ((), ())),
                                preferred_element_type=jnp.float32)
        return s, v_blk

    # Interior key blocks (ki < qi): fully below the diagonal -> no mask needed.
    def _interior(ki, carry):
        s, v_blk = _scores(pl.multiple_of(ki * tk, tk))
        _update(s, v_blk)
        return carry

    jax.lax.fori_loop(0, qi, _interior, 0)

    # Diagonal block (ki == qi): the only block that needs the causal mask.
    s, v_blk = _scores(pl.multiple_of(qi * tk, tk))
    row = jax.lax.broadcasted_iota(jnp.int32, (tq, tk), 0)
    col = jax.lax.broadcasted_iota(jnp.int32, (tq, tk), 1)
    s = jnp.where(col <= row, s, -1e30)
    _update(s, v_blk)

    o_ref[...] = (acc_sc[...] * pl.reciprocal(l_sc[...], approx=True)
                  ).astype(o_ref.dtype)


def flash_attention(q, k, v):
    """q, k, v: (B*H, S, Dh) bf16 -> (B*H, S, Dh) bf16, causal.

    The 1/sqrt(Dh) scale is assumed to be pre-folded into Wq at init."""
    G, S, Dh = q.shape
    tq = 128 if S % 128 == 0 else S     # 128x128 f32 score tile -> no vreg spill
    tk = tq                             # diagonal-block masking assumes tq == tk
    grid = (G, S // tq)
    kern = functools.partial(_flash_attention_kernel, tq=tq, tk=tk)
    cost = pl.CostEstimate(
        flops=2 * G * S * S * Dh,            # ~causal half of the dense 4*G*S*S*Dh
        transcendentals=G * S * S // 2,
        bytes_accessed=4 * G * S * Dh * 2)
    return pl.pallas_call(
        kern,
        out_shape=jax.ShapeDtypeStruct((G, S, Dh), jnp.bfloat16),
        grid=grid,
        in_specs=[
            pl.BlockSpec((None, tq, Dh), lambda g, qi: (g, qi, 0)),
            # Full K/V per head; block index constant across qi -> one DMA per head.
            pl.BlockSpec((None, S, Dh), lambda g, qi: (g, 0, 0)),
            pl.BlockSpec((None, S, Dh), lambda g, qi: (g, 0, 0)),
        ],
        out_specs=pl.BlockSpec((None, tq, Dh), lambda g, qi: (g, qi, 0)),
        scratch_shapes=[
            pltpu.VMEM((tq, 1), jnp.float32),    # running max
            pltpu.VMEM((tq, 1), jnp.float32),    # running denom
            pltpu.VMEM((tq, Dh), jnp.float32),   # output accumulator
        ],
        compiler_params=pltpu.CompilerParams(
            dimension_semantics=("parallel", "parallel"),
            vmem_limit_bytes=_vmem_limit_bytes()),
        cost_estimate=cost,
    )(q, k, v)


# ----------------------------------------------------------------------------
# Parameter init (std=0.02 normals, zero biases, LN gamma=1; weights stored
# pre-transposed (in, out) in bf16; attention scale folded into Wq; vocab
# projection padded to a 128 multiple)
# ----------------------------------------------------------------------------

def init_params(key, vocab_size, d_model, num_heads, num_layers, context_length):
    d_ff = 4 * d_model
    head_dim = d_model // num_heads
    vocab_padded = _round_up(vocab_size, 128)
    keys = iter(jax.random.split(key, 3 + num_layers * 6))

    def normal(shape):
        return 0.02 * jax.random.normal(next(keys), shape, dtype=jnp.float32)

    def linear_w(fan_in, fan_out, scale=1.0):
        # nn.Linear weight is (out, in); pre-transpose once at init so kernels
        # never emit an HBM transpose, and cast to bf16 for the MXU.
        return (normal((fan_out, fan_in)).T * scale).astype(jnp.bfloat16)

    out_w = linear_w(d_model, vocab_size)                         # (D, V) bf16
    out_w = jnp.pad(out_w, ((0, 0), (0, vocab_padded - vocab_size)))

    params = {
        "tok_emb": normal((vocab_size, d_model)),
        "pos_emb": normal((1, context_length, d_model)),
        "layers": [],
        "norm_g": jnp.ones((d_model,), jnp.float32),
        "norm_b": jnp.zeros((d_model,), jnp.float32),
        "out_w": out_w,                                           # (D, Vp) bf16
        "out_b": jnp.zeros((vocab_padded,), jnp.float32),
    }
    for _ in range(num_layers):
        # Fold the 1/sqrt(Dh) attention scale into Wq (q bias is zero-init, so
        # nothing else needs scaling).
        wq = linear_w(d_model, d_model, scale=1.0 / math.sqrt(head_dim))
        wk = linear_w(d_model, d_model)
        wv = linear_w(d_model, d_model)
        layer = {
            "ln1_g": jnp.ones((d_model,), jnp.float32),
            "ln1_b": jnp.zeros((d_model,), jnp.float32),
            "wqkv": jnp.concatenate([wq, wk, wv], axis=1),        # (D, 3D) bf16
            "bqkv": jnp.zeros((3 * d_model,), jnp.float32),
            "wo": linear_w(d_model, d_model),
            "bo": jnp.zeros((d_model,), jnp.float32),
            "ln2_g": jnp.ones((d_model,), jnp.float32),
            "ln2_b": jnp.zeros((d_model,), jnp.float32),
            "w1": linear_w(d_model, d_ff),
            "b1": jnp.zeros((d_ff,), jnp.float32),
            "w2": linear_w(d_ff, d_model),
            "b2": jnp.zeros((d_model,), jnp.float32),
        }
        params["layers"].append(layer)
    return params


# ----------------------------------------------------------------------------
# Forward pass
# ----------------------------------------------------------------------------

def text_gpt_forward(params, tokens, num_heads):
    B, S = tokens.shape
    V, D = params["tok_emb"].shape
    H = num_heads
    Dh = D // H

    # Embedding gather + positional embedding (glue; stays in XLA).
    x = jnp.take(params["tok_emb"], tokens, axis=0) + params["pos_emb"][:, :S, :]
    x = x.reshape(B * S, D)          # f32 residual stream, kept flat

    for layer in params["layers"]:
        # --- attention sub-block: LN1 + fused QKV in one kernel ---
        qkv = ln_matmul(x, layer["ln1_g"], layer["ln1_b"],
                        layer["wqkv"], layer["bqkv"],
                        out_dtype=jnp.bfloat16)                   # (B*S, 3D)
        # TODO(synk): when Dh % 128 == 0 this split/merge can be folded into the
        # attention BlockSpec index_maps (grid over B, H); at Dh < 128 it stays
        # as XLA glue.
        qkv = (qkv.reshape(B, S, 3, H, Dh)
                   .transpose(2, 0, 3, 1, 4)
                   .reshape(3, B * H, S, Dh))
        ctx = flash_attention(qkv[0], qkv[1], qkv[2])             # (B*H, S, Dh)
        ctx = (ctx.reshape(B, H, S, Dh)
                  .transpose(0, 2, 1, 3)
                  .reshape(B * S, D))
        # Wo projection + residual add (residual aliased into the output).
        x = matmul_residual(x, ctx, layer["wo"], layer["bo"])

        # --- MLP sub-block: LN2 + FC1 + GELU in one kernel, FC2 + residual ---
        h = ln_matmul(x, layer["ln2_g"], layer["ln2_b"],
                      layer["w1"], layer["b1"],
                      activation="gelu", out_dtype=jnp.bfloat16)  # (B*S, 4D)
        x = matmul_residual(x, h, layer["w2"], layer["b2"])

    # Final LayerNorm fused with the (vocab-padded) output projection.
    logits = ln_matmul(x, params["norm_g"], params["norm_b"],
                       params["out_w"], params["out_b"],
                       out_dtype=jnp.float32)
    return logits.reshape(B, S, -1)[:, :, :V]


# ----------------------------------------------------------------------------
# Main
# ----------------------------------------------------------------------------

if __name__ == "__main__":
    vocab_size = 64
    d_model = 32
    num_heads = 4
    num_layers = 2
    context_length = 16

    batch = 2
    seq = 8

    key = jax.random.PRNGKey(0)
    pkey, tkey = jax.random.split(key)
    params = init_params(pkey, vocab_size, d_model, num_heads, num_layers,
                         context_length)
    tokens = jax.random.randint(tkey, (batch, seq), 0, vocab_size,
                                dtype=jnp.int32)

    forward = jax.jit(text_gpt_forward, static_argnames=("num_heads",))
    logits = forward(params, tokens, num_heads=num_heads)
    logits = jax.block_until_ready(logits)
    assert logits.shape == (batch, seq, vocab_size)
    assert bool(jnp.all(jnp.isfinite(logits)))
    print("KERNEL_OK")
</pallas_src>

<mosaic_0001>
module attributes {stable_mosaic.version = 11 : i64} {
  func.func @_ln_matmul_kernel(%arg0: i32, %arg1: i32, %arg2: memref<16x32xf32, #tpu.memory_space<vmem>>, %arg3: memref<1x32xf32, #tpu.memory_space<vmem>>, %arg4: memref<1x32xf32, #tpu.memory_space<vmem>>, %arg5: memref<32x96xbf16, #tpu.memory_space<vmem>>, %arg6: memref<1x96xf32, #tpu.memory_space<vmem>>, %arg7: memref<16x96xbf16, #tpu.memory_space<vmem>>, %arg8: memref<16x32xbf16, #tpu.memory_space<vmem>>) attributes {dimension_semantics = [#tpu.dimension_semantics<parallel>, #tpu.dimension_semantics<arbitrary>], iteration_bounds = array<i64: 1, 1>, scalar_prefetch = 0 : i64, scratch_operands = 1 : i64, tpu.core_type = #tpu.core_type<tc>, window_params = [{transform_indices = @transform_0, window_bounds = array<i64: 16, 32>}, {pipeline_mode = #tpu.pipeline_mode<synchronous>, transform_indices = @transform_1, window_bounds = array<i64: 1, 32>}, {pipeline_mode = #tpu.pipeline_mode<synchronous>, transform_indices = @transform_2, window_bounds = array<i64: 1, 32>}, {transform_indices = @transform_3, window_bounds = array<i64: 32, 96>}, {transform_indices = @transform_4, window_bounds = array<i64: 1, 96>}, {transform_indices = @transform_5, window_bounds = array<i64: 16, 96>}]} {
    %c0_i32 = arith.constant 0 : i32
    %0 = arith.cmpi eq, %arg1, %c0_i32 : i32
    %1 = arith.extui %0 : i1 to i32
    %c0_i32_0 = arith.constant 0 : i32
    %2 = arith.cmpi ne, %1, %c0_i32_0 : i32
    scf.if %2 {
      %c0_8 = arith.constant 0 : index
      %c0_9 = arith.constant 0 : index
      %11 = vector.load %arg2[%c0_8, %c0_9] : memref<16x32xf32, #tpu.memory_space<vmem>>, vector<16x32xf32>
      %cst_10 = arith.constant dense<0.000000e+00> : vector<16xf32>
      %12 = vector.multi_reduction <add>, %11, %cst_10 [1] : vector<16x32xf32> to vector<16xf32>
      %13 = vector.shape_cast %12 : vector<16xf32> to vector<16x1xf32>
      %cst_11 = arith.constant 3.200000e+01 : f32
      %14 = vector.broadcast %cst_11 : f32 to vector<16x1xf32>
      %15 = arith.divf %13, %14 : vector<16x1xf32>
      %16 = vector.broadcast %15 : vector<16x1xf32> to vector<16x32xf32>
      %17 = arith.subf %11, %16 : vector<16x32xf32>
      %18 = arith.mulf %17, %17 : vector<16x32xf32>
      %cst_12 = arith.constant dense<0.000000e+00> : vector<16xf32>
      %19 = vector.multi_reduction <add>, %18, %cst_12 [1] : vector<16x32xf32> to vector<16xf32>
      %20 = vector.shape_cast %19 : vector<16xf32> to vector<16x1xf32>
      %cst_13 = arith.constant 3.200000e+01 : f32
      %21 = vector.broadcast %cst_13 : f32 to vector<16x1xf32>
      %22 = arith.divf %20, %21 : vector<16x1xf32>
      %23 = vector.broadcast %15 : vector<16x1xf32> to vector<16x32xf32>
      %24 = arith.subf %11, %23 : vector<16x32xf32>
      %cst_14 = arith.constant 9.99999974E-6 : f32
      %25 = vector.broadcast %cst_14 : f32 to vector<16x1xf32>
      %26 = arith.addf %22, %25 : vector<16x1xf32>
      %27 = math.rsqrt %26 : vector<16x1xf32>
      %28 = vector.broadcast %27 : vector<16x1xf32> to vector<16x32xf32>
      %29 = arith.mulf %24, %28 : vector<16x32xf32>
      %c0_15 = arith.constant 0 : index
      %c0_16 = arith.constant 0 : index
      %30 = vector.load %arg3[%c0_15, %c0_16] : memref<1x32xf32, #tpu.memory_space<vmem>>, vector<1x32xf32>
      %31 = vector.broadcast %30 : vector<1x32xf32> to vector<16x32xf32>
      %32 = arith.mulf %29, %31 : vector<16x32xf32>
      %c0_17 = arith.constant 0 : index
      %c0_18 = arith.constant 0 : index
      %33 = vector.load %arg4[%c0_17, %c0_18] : memref<1x32xf32, #tpu.memory_space<vmem>>, vector<1x32xf32>
      %34 = vector.broadcast %33 : vector<1x32xf32> to vector<16x32xf32>
      %35 = arith.addf %32, %34 : vector<16x32xf32>
      %36 = arith.truncf %35 : vector<16x32xf32> to vector<16x32xbf16>
      %c0_19 = arith.constant 0 : index
      %c0_20 = arith.constant 0 : index
      %37 = vector.load %arg8[%c0_19, %c0_20] : memref<16x32xbf16, #tpu.memory_space<vmem>>, vector<16x32xbf16>
      tpu.vector_store %arg8[%c0_19, %c0_20], %36 {strides = array<i32>} : memref<16x32xbf16, #tpu.memory_space<vmem>>, vector<16x32xbf16>,
    } else {
    }
    %c0 = arith.constant 0 : index
    %c0_1 = arith.constant 0 : index
    %3 = vector.load %arg8[%c0, %c0_1] : memref<16x32xbf16, #tpu.memory_space<vmem>>, vector<16x32xbf16>
    %c0_2 = arith.constant 0 : index
    %c0_3 = arith.constant 0 : index
    %4 = vector.load %arg5[%c0_2, %c0_3] : memref<32x96xbf16, #tpu.memory_space<vmem>>, vector<32x96xbf16>
    %cst = arith.constant dense<0.000000e+00> : vector<16x96xf32>
    %5 = tpu.matmul %3, %4, %cst {dimension_numbers = #tpu.dot_dimension_numbers<[1], [0], [0], [1], [0, 0, 1, 1], [], []>} : vector<16x32xbf16>, vector<32x96xbf16>, vector<16x96xf32> -> vector<16x96xf32>
    %c0_4 = arith.constant 0 : index
    %c0_5 = arith.constant 0 : index
    %6 = vector.load %arg6[%c0_4, %c0_5] : memref<1x96xf32, #tpu.memory_space<vmem>>, vector<1x96xf32>
    %7 = vector.broadcast %6 : vector<1x96xf32> to vector<16x96xf32>
    %8 = arith.addf %5, %7 : vector<16x96xf32>
    %9 = arith.truncf %8 : vector<16x96xf32> to vector<16x96xbf16>
    %c0_6 = arith.constant 0 : index
    %c0_7 = arith.constant 0 : index
    %10 = vector.load %arg7[%c0_6, %c0_7] : memref<16x96xbf16, #tpu.memory_space<vmem>>, vector<16x96xbf16>
    tpu.vector_store %arg7[%c0_6, %c0_7], %9 {strides = array<i32>} : memref<16x96xbf16, #tpu.memory_space<vmem>>, vector<16x96xbf16>,
    return
  }
  func.func @transform_0(%arg0: i32, %arg1: i32) -> (i32, i32) {
    %c0_i32 = arith.constant 0 : i32
    %c0_i32_0 = arith.constant 0 : i32
    return %arg0, %c0_i32 : i32, i32
  }
  func.func @transform_1(%arg0: i32, %arg1: i32) -> (i32, i32) {
    %c0_i32 = arith.constant 0 : i32
    %c0_i32_0 = arith.constant 0 : i32
    %c0_i32_1 = arith.constant 0 : i32
    return %c0_i32, %c0_i32_0 : i32, i32
  }
  func.func @transform_2(%arg0: i32, %arg1: i32) -> (i32, i32) {
    %c0_i32 = arith.constant 0 : i32
    %c0_i32_0 = arith.constant 0 : i32
    %c0_i32_1 = arith.constant 0 : i32
    return %c0_i32, %c0_i32_0 : i32, i32
  }
  func.func @transform_3(%arg0: i32, %arg1: i32) -> (i32, i32) {
    %c0_i32 = arith.constant 0 : i32
    %c0_i32_0 = arith.constant 0 : i32
    return %c0_i32, %arg1 : i32, i32
  }
  func.func @transform_4(%arg0: i32, %arg1: i32) -> (i32, i32) {
    %c0_i32 = arith.constant 0 : i32
    %c0_i32_0 = arith.constant 0 : i32
    return %c0_i32, %arg1 : i32, i32
  }
  func.func @transform_5(%arg0: i32, %arg1: i32) -> (i32, i32) {
    %c0_i32 = arith.constant 0 : i32
    return %arg0, %arg1 : i32, i32
  }
}

module attributes {stable_mosaic.version = 11 : i64} {
  func.func @_flash_attention_kernel(%arg0: i32, %arg1: i32, %arg2: memref<1x8x8xbf16, #tpu.memory_space<vmem>>, %arg3: memref<1x8x8xbf16, #tpu.memory_space<vmem>>, %arg4: memref<1x8x8xbf16, #tpu.memory_space<vmem>>, %arg5: memref<1x8x8xbf16, #tpu.memory_space<vmem>>, %arg6: memref<8x1xf32, #tpu.memory_space<vmem>>, %arg7: memref<8x1xf32, #tpu.memory_space<vmem>>, %arg8: memref<8x8xf32, #tpu.memory_space<vmem>>) attributes {dimension_semantics = [#tpu.dimension_semantics<parallel>, #tpu.dimension_semantics<parallel>], iteration_bounds = array<i64: 8, 1>, scalar_prefetch = 0 : i64, scratch_operands = 3 : i64, tpu.core_type = #tpu.core_type<tc>, window_params = [{transform_indices = @transform_0, window_bounds = array<i64: 1, 8, 8>}, {transform_indices = @transform_1, window_bounds = array<i64: 1, 8, 8>}, {transform_indices = @transform_2, window_bounds = array<i64: 1, 8, 8>}, {transform_indices = @transform_3, window_bounds = array<i64: 1, 8, 8>}]} {
    %cst = arith.constant -1.000000e+30 : f32
    %0 = vector.broadcast %cst : f32 to vector<8x1xf32>
    %c0 = arith.constant 0 : index
    %c0_0 = arith.constant 0 : index
    %1 = vector.load %arg6[%c0, %c0_0] : memref<8x1xf32, #tpu.memory_space<vmem>>, vector<8x1xf32>
    tpu.vector_store %arg6[%c0, %c0_0], %0 {strides = array<i32>} : memref<8x1xf32, #tpu.memory_space<vmem>>, vector<8x1xf32>,
    %cst_1 = arith.constant 0.000000e+00 : f32
    %2 = vector.broadcast %cst_1 : f32 to vector<8x1xf32>
    %c0_2 = arith.constant 0 : index
    %c0_3 = arith.constant 0 : index
    %3 = vector.load %arg7[%c0_2, %c0_3] : memref<8x1xf32, #tpu.memory_space<vmem>>, vector<8x1xf32>
    tpu.vector_store %arg7[%c0_2, %c0_3], %2 {strides = array<i32>} : memref<8x1xf32, #tpu.memory_space<vmem>>, vector<8x1xf32>,
    %cst_4 = arith.constant 0.000000e+00 : f32
    %4 = vector.broadcast %cst_4 : f32 to vector<8x8xf32>
    %c0_5 = arith.constant 0 : index
    %c0_6 = arith.constant 0 : index
    %5 = vector.load %arg8[%c0_5, %c0_6] : memref<8x8xf32, #tpu.memory_space<vmem>>, vector<8x8xf32>
    tpu.vector_store %arg8[%c0_5, %c0_6], %4 {strides = array<i32>} : memref<8x8xf32, #tpu.memory_space<vmem>>, vector<8x8xf32>,
    %c0_7 = arith.constant 0 : index
    %c0_8 = arith.constant 0 : index
    %c0_9 = arith.constant 0 : index
    %6 = vector.load %arg2[%c0_7, %c0_8, %c0_9] : memref<1x8x8xbf16, #tpu.memory_space<vmem>>, vector<1x8x8xbf16>
    %7 = vector.shape_cast %6 : vector<1x8x8xbf16> to vector<8x8xbf16>
    %c0_i32 = arith.constant 0 : i32
    %c0_i32_10 = arith.constant 0 : i32
    %8 = arith.subi %arg1, %c0_i32_10 : i32
    %9 = arith.addi %c0_i32_10, %8 : i32
    %c1_i32 = arith.constant 1 : i32
    scf.for %arg9 = %c0_i32_10 to %9 step %c1_i32  : i32 {
      %c8_i32_39 = arith.constant 8 : i32
      %56 = arith.muli %arg9, %c8_i32_39 : i32
      %57 = tpu.assume_multiple %56, 8 : i32
      %c0_40 = arith.constant 0 : index
      %58 = arith.index_cast %57 : i32 to index
      %c0_41 = arith.constant 0 : index
      %59 = vector.load %arg3[%c0_40, %58, %c0_41] : memref<1x8x8xbf16, #tpu.memory_space<vmem>>, vector<1x8x8xbf16>
      %60 = vector.shape_cast %59 : vector<1x8x8xbf16> to vector<8x8xbf16>
      %c0_42 = arith.constant 0 : index
      %61 = arith.index_cast %57 : i32 to index
      %c0_43 = arith.constant 0 : index
      %62 = vector.load %arg4[%c0_42, %61, %c0_43] : memref<1x8x8xbf16, #tpu.memory_space<vmem>>, vector<1x8x8xbf16>
      %63 = vector.shape_cast %62 : vector<1x8x8xbf16> to vector<8x8xbf16>
      %cst_44 = arith.constant dense<0.000000e+00> : vector<8x8xf32>
      %64 = tpu.matmul %7, %60, %cst_44 {dimension_numbers = #tpu.dot_dimension_numbers<[1], [1], [0], [0], [0, 0, 1, 0], [], []>} : vector<8x8xbf16>, vector<8x8xbf16>, vector<8x8xf32> -> vector<8x8xf32>
      %c0_45 = arith.constant 0 : index
      %c0_46 = arith.constant 0 : index
      %65 = vector.load %arg6[%c0_45, %c0_46] : memref<8x1xf32, #tpu.memory_space<vmem>>, vector<8x1xf32>
      %cst_47 = arith.constant dense<0xFF800000> : vector<8xf32>
      %66 = vector.multi_reduction <maximumf>, %64, %cst_47 [1] : vector<8x8xf32> to vector<8xf32>
      %67 = vector.shape_cast %66 : vector<8xf32> to vector<8x1xf32>
      %68 = arith.maximumf %65, %67 : vector<8x1xf32>
      %69 = arith.subf %65, %68 : vector<8x1xf32>
      %70 = math.exp %69 : vector<8x1xf32>
      %71 = vector.broadcast %68 : vector<8x1xf32> to vector<8x8xf32>
      %72 = arith.subf %64, %71 : vector<8x8xf32>
      %73 = math.exp %72 : vector<8x8xf32>
      %c0_48 = arith.constant 0 : index
      %c0_49 = arith.constant 0 : index
      %74 = vector.load %arg7[%c0_48, %c0_49] : memref<8x1xf32, #tpu.memory_space<vmem>>, vector<8x1xf32>
      %75 = arith.mulf %70, %74 : vector<8x1xf32>
      %cst_50 = arith.constant dense<0.000000e+00> : vector<8xf32>
      %76 = vector.multi_reduction <add>, %73, %cst_50 [1] : vector<8x8xf32> to vector<8xf32>
      %77 = vector.shape_cast %76 : vector<8xf32> to vector<8x1xf32>
      %78 = arith.addf %75, %77 : vector<8x1xf32>
      %c0_51 = arith.constant 0 : index
      %c0_52 = arith.constant 0 : index
      %79 = vector.load %arg7[%c0_51, %c0_52] : memref<8x1xf32, #tpu.memory_space<vmem>>, vector<8x1xf32>
      tpu.vector_store %arg7[%c0_51, %c0_52], %78 {strides = array<i32>} : memref<8x1xf32, #tpu.memory_space<vmem>>, vector<8x1xf32>,
      %c0_53 = arith.constant 0 : index
      %c0_54 = arith.constant 0 : index
      %80 = vector.load %arg8[%c0_53, %c0_54] : memref<8x8xf32, #tpu.memory_space<vmem>>, vector<8x8xf32>
      %81 = vector.broadcast %70 : vector<8x1xf32> to vector<8x8xf32>
      %82 = arith.mulf %81, %80 : vector<8x8xf32>
      %83 = arith.truncf %73 : vector<8x8xf32> to vector<8x8xbf16>
      %cst_55 = arith.constant dense<0.000000e+00> : vector<8x8xf32>
      %84 = tpu.matmul %83, %63, %cst_55 {dimension_numbers = #tpu.dot_dimension_numbers<[1], [0], [0], [1], [0, 0, 1, 1], [], []>} : vector<8x8xbf16>, vector<8x8xbf16>, vector<8x8xf32> -> vector<8x8xf32>
      %85 = arith.addf %82, %84 : vector<8x8xf32>
      %c0_56 = arith.constant 0 : index
      %c0_57 = arith.constant 0 : index
      %86 = vector.load %arg8[%c0_56, %c0_57] : memref<8x8xf32, #tpu.memory_space<vmem>>, vector<8x8xf32>
      tpu.vector_store %arg8[%c0_56, %c0_57], %85 {strides = array<i32>} : memref<8x8xf32, #tpu.memory_space<vmem>>, vector<8x8xf32>,
      %c0_58 = arith.constant 0 : index
      %c0_59 = arith.constant 0 : index
      %87 = vector.load %arg6[%c0_58, %c0_59] : memref<8x1xf32, #tpu.memory_space<vmem>>, vector<8x1xf32>
      tpu.vector_store %arg6[%c0_58, %c0_59], %68 {strides = array<i32>} : memref<8x1xf32, #tpu.memory_space<vmem>>, vector<8x1xf32>,
    }
    %c8_i32 = arith.constant 8 : i32
    %10 = arith.muli %arg1, %c8_i32 : i32
    %11 = tpu.assume_multiple %10, 8 : i32
    %c0_11 = arith.constant 0 : index
    %12 = arith.index_cast %11 : i32 to index
    %c0_12 = arith.constant 0 : index
    %13 = vector.load %arg3[%c0_11, %12, %c0_12] : memref<1x8x8xbf16, #tpu.memory_space<vmem>>, vector<1x8x8xbf16>
    %14 = vector.shape_cast %13 : vector<1x8x8xbf16> to vector<8x8xbf16>
    %c0_13 = arith.constant 0 : index
    %15 = arith.index_cast %11 : i32 to index
    %c0_14 = arith.constant 0 : index
    %16 = vector.load %arg4[%c0_13, %15, %c0_14] : memref<1x8x8xbf16, #tpu.memory_space<vmem>>, vector<1x8x8xbf16>
    %17 = vector.shape_cast %16 : vector<1x8x8xbf16> to vector<8x8xbf16>
    %cst_15 = arith.constant dense<0.000000e+00> : vector<8x8xf32>
    %18 = tpu.matmul %7, %14, %cst_15 {dimension_numbers = #tpu.dot_dimension_numbers<[1], [1], [0], [0], [0, 0, 1, 0], [], []>} : vector<8x8xbf16>, vector<8x8xbf16>, vector<8x8xf32> -> vector<8x8xf32>
    %19 = tpu.iota {dimensions = array<i32: 0>} : vector<8x8xi32>
    %20 = tpu.iota {dimensions = array<i32: 1>} : vector<8x8xi32>
    %21 = arith.cmpi sle, %20, %19 : vector<8x8xi32>
    %cst_16 = arith.constant -1.000000e+30 : f32
    %22 = vector.broadcast %cst_16 : f32 to vector<8x8xf32>
    %23 = arith.select %21, %18, %22 : vector<8x8xi1>, vector<8x8xf32>
    %c0_17 = arith.constant 0 : index
    %c0_18 = arith.constant 0 : index
    %24 = vector.load %arg6[%c0_17, %c0_18] : memref<8x1xf32, #tpu.memory_space<vmem>>, vector<8x1xf32>
    %cst_19 = arith.constant dense<0xFF800000> : vector<8xf32>
    %25 = vector.multi_reduction <maximumf>, %23, %cst_19 [1] : vector<8x8xf32> to vector<8xf32>
    %26 = vector.shape_cast %25 : vector<8xf32> to vector<8x1xf32>
    %27 = arith.maximumf %24, %26 : vector<8x1xf32>
    %28 = arith.subf %24, %27 : vector<8x1xf32>
    %29 = math.exp %28 : vector<8x1xf32>
    %30 = vector.broadcast %27 : vector<8x1xf32> to vector<8x8xf32>
    %31 = arith.subf %23, %30 : vector<8x8xf32>
    %32 = math.exp %31 : vector<8x8xf32>
    %c0_20 = arith.constant 0 : index
    %c0_21 = arith.constant 0 : index
    %33 = vector.load %arg7[%c0_20, %c0_21] : memref<8x1xf32, #tpu.memory_space<vmem>>, vector<8x1xf32>
    %34 = arith.mulf %29, %33 : vector<8x1xf32>
    %cst_22 = arith.constant dense<0.000000e+00> : vector<8xf32>
    %35 = vector.multi_reduction <add>, %32, %cst_22 [1] : vector<8x8xf32> to vector<8xf32>
    %36 = vector.shape_cast %35 : vector<8xf32> to vector<8x1xf32>
    %37 = arith.addf %34, %36 : vector<8x1xf32>
    %c0_23 = arith.constant 0 : index
    %c0_24 = arith.constant 0 : index
    %38 = vector.load %arg7[%c0_23, %c0_24] : memref<8x1xf32, #tpu.memory_space<vmem>>, vector<8x1xf32>
    tpu.vector_store %arg7[%c0_23, %c0_24], %37 {strides = array<i32>} : memref<8x1xf32, #tpu.memory_space<vmem>>, vector<8x1xf32>,
    %c0_25 = arith.constant 0 : index
    %c0_26 = arith.constant 0 : index
    %39 = vector.load %arg8[%c0_25, %c0_26] : memref<8x8xf32, #tpu.memory_space<vmem>>, vector<8x8xf32>
    %40 = vector.broadcast %29 : vector<8x1xf32> to vector<8x8xf32>
    %41 = arith.mulf %40, %39 : vector<8x8xf32>
    %42 = arith.truncf %32 : vector<8x8xf32> to vector<8x8xbf16>
    %cst_27 = arith.constant dense<0.000000e+00> : vector<8x8xf32>
    %43 = tpu.matmul %42, %17, %cst_27 {dimension_numbers = #tpu.dot_dimension_numbers<[1], [0], [0], [1], [0, 0, 1, 1], [], []>} : vector<8x8xbf16>, vector<8x8xbf16>, vector<8x8xf32> -> vector<8x8xf32>
    %44 = arith.addf %41, %43 : vector<8x8xf32>
    %c0_28 = arith.constant 0 : index
    %c0_29 = arith.constant 0 : index
    %45 = vector.load %arg8[%c0_28, %c0_29] : memref<8x8xf32, #tpu.memory_space<vmem>>, vector<8x8xf32>
    tpu.vector_store %arg8[%c0_28, %c0_29], %44 {strides = array<i32>} : memref<8x8xf32, #tpu.memory_space<vmem>>, vector<8x8xf32>,
    %c0_30 = arith.constant 0 : index
    %c0_31 = arith.constant 0 : index
    %46 = vector.load %arg6[%c0_30, %c0_31] : memref<8x1xf32, #tpu.memory_space<vmem>>, vector<8x1xf32>
    tpu.vector_store %arg6[%c0_30, %c0_31], %27 {strides = array<i32>} : memref<8x1xf32, #tpu.memory_space<vmem>>, vector<8x1xf32>,
    %c0_32 = arith.constant 0 : index
    %c0_33 = arith.constant 0 : index
    %47 = vector.load %arg8[%c0_32, %c0_33] : memref<8x8xf32, #tpu.memory_space<vmem>>, vector<8x8xf32>
    %c0_34 = arith.constant 0 : index
    %c0_35 = arith.constant 0 : index
    %48 = vector.load %arg7[%c0_34, %c0_35] : memref<8x1xf32, #tpu.memory_space<vmem>>, vector<8x1xf32>
    %49 = tpu.reciprocal %48 {approx = true} : vector<8x1xf32> -> vector<8x1xf32>
    %50 = vector.broadcast %49 : vector<8x1xf32> to vector<8x8xf32>
    %51 = arith.mulf %47, %50 : vector<8x8xf32>
    %52 = arith.truncf %51 : vector<8x8xf32> to vector<8x8xbf16>
    %c0_36 = arith.constant 0 : index
    %c0_37 = arith.constant 0 : index
    %c0_38 = arith.constant 0 : index
    %53 = vector.load %arg5[%c0_36, %c0_37, %c0_38] : memref<1x8x8xbf16, #tpu.memory_space<vmem>>, vector<1x8x8xbf16>
    %54 = vector.shape_cast %53 : vector<1x8x8xbf16> to vector<8x8xbf16>
    %55 = vector.shape_cast %52 : vector<8x8xbf16> to vector<1x8x8xbf16>
    tpu.vector_store %arg5[%c0_36, %c0_37, %c0_38], %55 {strides = array<i32>} : memref<1x8x8xbf16, #tpu.memory_space<vmem>>, vector<1x8x8xbf16>,
    return
  }
  func.func @transform_0(%arg0: i32, %arg1: i32) -> (i32, i32, i32) {
    %c0_i32 = arith.constant 0 : i32
    %c0_i32_0 = arith.constant 0 : i32
    return %arg0, %arg1, %c0_i32 : i32, i32, i32
  }
  func.func @transform_1(%arg0: i32, %arg1: i32) -> (i32, i32, i32) {
    %c0_i32 = arith.constant 0 : i32
    %c0_i32_0 = arith.constant 0 : i32
    %c0_i32_1 = arith.constant 0 : i32
    return %arg0, %c0_i32, %c0_i32_0 : i32, i32, i32
  }
  func.func @transform_2(%arg0: i32, %arg1: i32) -> (i32, i32, i32) {
    %c0_i32 = arith.constant 0 : i32
    %c0_i32_0 = arith.constant 0 : i32
    %c0_i32_1 = arith.constant 0 : i32
    return %arg0, %c0_i32, %c0_i32_0 : i32, i32, i32
  }
  func.func @transform_3(%arg0: i32, %arg1: i32) -> (i32, i32, i32) {
    %c0_i32 = arith.constant 0 : i32
    %c0_i32_0 = arith.constant 0 : i32
    return %arg0, %arg1, %c0_i32 : i32, i32, i32
  }
}

module attributes {stable_mosaic.version = 11 : i64} {
  func.func @_matmul_residual_kernel(%arg0: i32, %arg1: i32, %arg2: i32, %arg3: memref<16x32xf32, #tpu.memory_space<vmem>>, %arg4: memref<16x32xbf16, #tpu.memory_space<vmem>>, %arg5: memref<32x32xbf16, #tpu.memory_space<vmem>>, %arg6: memref<1x32xf32, #tpu.memory_space<vmem>>, %arg7: memref<16x32xf32, #tpu.memory_space<vmem>>, %arg8: memref<16x32xf32, #tpu.memory_space<vmem>>) attributes {dimension_semantics = [#tpu.dimension_semantics<parallel>, #tpu.dimension_semantics<parallel>, #tpu.dimension_semantics<arbitrary>], iteration_bounds = array<i64: 1, 1, 1>, scalar_prefetch = 0 : i64, scratch_operands = 1 : i64, tpu.core_type = #tpu.core_type<tc>, window_params = [{transform_indices = @transform_0, window_bounds = array<i64: 16, 32>}, {transform_indices = @transform_1, window_bounds = array<i64: 16, 32>}, {transform_indices = @transform_2, window_bounds = array<i64: 32, 32>}, {transform_indices = @transform_3, window_bounds = array<i64: 1, 32>}, {transform_indices = @transform_4, window_bounds = array<i64: 16, 32>}]} {
    %c0_i32 = arith.constant 0 : i32
    %0 = arith.cmpi eq, %arg2, %c0_i32 : i32
    %1 = arith.extui %0 : i1 to i32
    %c0_i32_0 = arith.constant 0 : i32
    %2 = arith.cmpi ne, %1, %c0_i32_0 : i32
    scf.if %2 {
      %cst_10 = arith.constant 0.000000e+00 : f32
      %12 = vector.broadcast %cst_10 : f32 to vector<16x32xf32>
      %c0_11 = arith.constant 0 : index
      %c0_12 = arith.constant 0 : index
      %13 = vector.load %arg8[%c0_11, %c0_12] : memref<16x32xf32, #tpu.memory_space<vmem>>, vector<16x32xf32>
      tpu.vector_store %arg8[%c0_11, %c0_12], %12 {strides = array<i32>} : memref<16x32xf32, #tpu.memory_space<vmem>>, vector<16x32xf32>,
    } else {
    }
    %c0 = arith.constant 0 : index
    %c0_1 = arith.constant 0 : index
    %3 = vector.load %arg8[%c0, %c0_1] : memref<16x32xf32, #tpu.memory_space<vmem>>, vector<16x32xf32>
    %c0_2 = arith.constant 0 : index
    %c0_3 = arith.constant 0 : index
    %4 = vector.load %arg4[%c0_2, %c0_3] : memref<16x32xbf16, #tpu.memory_space<vmem>>, vector<16x32xbf16>
    %c0_4 = arith.constant 0 : index
    %c0_5 = arith.constant 0 : index
    %5 = vector.load %arg5[%c0_4, %c0_5] : memref<32x32xbf16, #tpu.memory_space<vmem>>, vector<32x32xbf16>
    %cst = arith.constant dense<0.000000e+00> : vector<16x32xf32>
    %6 = tpu.matmul %4, %5, %cst {dimension_numbers = #tpu.dot_dimension_numbers<[1], [0], [0], [1], [0, 0, 1, 1], [], []>} : vector<16x32xbf16>, vector<32x32xbf16>, vector<16x32xf32> -> vector<16x32xf32>
    %7 = arith.addf %3, %6 : vector<16x32xf32>
    %c0_6 = arith.constant 0 : index
    %c0_7 = arith.constant 0 : index
    %8 = vector.load %arg8[%c0_6, %c0_7] : memref<16x32xf32, #tpu.memory_space<vmem>>, vector<16x32xf32>
    tpu.vector_store %arg8[%c0_6, %c0_7], %7 {strides = array<i32>} : memref<16x32xf32, #tpu.memory_space<vmem>>, vector<16x32xf32>,
    %c0_i32_8 = arith.constant 0 : i32
    %9 = arith.cmpi eq, %arg2, %c0_i32_8 : i32
    %10 = arith.extui %9 : i1 to i32
    %c0_i32_9 = arith.constant 0 : i32
    %11 = arith.cmpi ne, %10, %c0_i32_9 : i32
    scf.if %11 {
      %c0_10 = arith.constant 0 : index
      %c0_11 = arith.constant 0 : index
      %12 = vector.load %arg3[%c0_10, %c0_11] : memref<16x32xf32, #tpu.memory_space<vmem>>, vector<16x32xf32>
      %c0_12 = arith.constant 0 : index
      %c0_13 = arith.constant 0 : index
      %13 = vector.load %arg8[%c0_12, %c0_13] : memref<16x32xf32, #tpu.memory_space<vmem>>, vector<16x32xf32>
      %14 = arith.addf %12, %13 : vector<16x32xf32>
      %c0_14 = arith.constant 0 : index
      %c0_15 = arith.constant 0 : index
      %15 = vector.load %arg6[%c0_14, %c0_15] : memref<1x32xf32, #tpu.memory_space<vmem>>, vector<1x32xf32>
      %16 = vector.broadcast %15 : vector<1x32xf32> to vector<16x32xf32>
      %17 = arith.addf %14, %16 : vector<16x32xf32>
      %c0_16 = arith.constant 0 : index
      %c0_17 = arith.constant 0 : index
      %18 = vector.load %arg7[%c0_16, %c0_17] : memref<16x32xf32, #tpu.memory_space<vmem>>, vector<16x32xf32>
      tpu.vector_store %arg7[%c0_16, %c0_17], %17 {strides = array<i32>} : memref<16x32xf32, #tpu.memory_space<vmem>>, vector<16x32xf32>,
    } else {
    }
    return
  }
  func.func @transform_0(%arg0: i32, %arg1: i32, %arg2: i32) -> (i32, i32) {
    %c0_i32 = arith.constant 0 : i32
    return %arg0, %arg1 : i32, i32
  }
  func.func @transform_1(%arg0: i32, %arg1: i32, %arg2: i32) -> (i32, i32) {
    %c0_i32 = arith.constant 0 : i32
    return %arg0, %arg2 : i32, i32
  }
  func.func @transform_2(%arg0: i32, %arg1: i32, %arg2: i32) -> (i32, i32) {
    %c0_i32 = arith.constant 0 : i32
    return %arg2, %arg1 : i32, i32
  }
  func.func @transform_3(%arg0: i32, %arg1: i32, %arg2: i32) -> (i32, i32) {
    %c0_i32 = arith.constant 0 : i32
    %c0_i32_0 = arith.constant 0 : i32
    return %c0_i32, %arg1 : i32, i32
  }
  func.func @transform_4(%arg0: i32, %arg1: i32, %arg2: i32) -> (i32, i32) {
    %c0_i32 = arith.constant 0 : i32
    return %arg0, %arg1 : i32, i32
  }
}

module attributes {stable_mosaic.version = 11 : i64} {
  func.func @_ln_matmul_kernel(%arg0: i32, %arg1: i32, %arg2: memref<16x32xf32, #tpu.memory_space<vmem>>, %arg3: memref<1x32xf32, #tpu.memory_space<vmem>>, %arg4: memref<1x32xf32, #tpu.memory_space<vmem>>, %arg5: memref<32x128xbf16, #tpu.memory_space<vmem>>, %arg6: memref<1x128xf32, #tpu.memory_space<vmem>>, %arg7: memref<16x128xbf16, #tpu.memory_space<vmem>>, %arg8: memref<16x32xbf16, #tpu.memory_space<vmem>>) attributes {dimension_semantics = [#tpu.dimension_semantics<parallel>, #tpu.dimension_semantics<arbitrary>], iteration_bounds = array<i64: 1, 1>, scalar_prefetch = 0 : i64, scratch_operands = 1 : i64, tpu.core_type = #tpu.core_type<tc>, window_params = [{transform_indices = @transform_0, window_bounds = array<i64: 16, 32>}, {pipeline_mode = #tpu.pipeline_mode<synchronous>, transform_indices = @transform_1, window_bounds = array<i64: 1, 32>}, {pipeline_mode = #tpu.pipeline_mode<synchronous>, transform_indices = @transform_2, window_bounds = array<i64: 1, 32>}, {transform_indices = @transform_3, window_bounds = array<i64: 32, 128>}, {transform_indices = @transform_4, window_bounds = array<i64: 1, 128>}, {transform_indices = @transform_5, window_bounds = array<i64: 16, 128>}]} {
    %c0_i32 = arith.constant 0 : i32
    %0 = arith.cmpi eq, %arg1, %c0_i32 : i32
    %1 = arith.extui %0 : i1 to i32
    %c0_i32_0 = arith.constant 0 : i32
    %2 = arith.cmpi ne, %1, %c0_i32_0 : i32
    scf.if %2 {
      %c0_12 = arith.constant 0 : index
      %c0_13 = arith.constant 0 : index
      %24 = vector.load %arg2[%c0_12, %c0_13] : memref<16x32xf32, #tpu.memory_space<vmem>>, vector<16x32xf32>
      %cst_14 = arith.constant dense<0.000000e+00> : vector<16xf32>
      %25 = vector.multi_reduction <add>, %24, %cst_14 [1] : vector<16x32xf32> to vector<16xf32>
      %26 = vector.shape_cast %25 : vector<16xf32> to vector<16x1xf32>
      %cst_15 = arith.constant 3.200000e+01 : f32
      %27 = vector.broadcast %cst_15 : f32 to vector<16x1xf32>
      %28 = arith.divf %26, %27 : vector<16x1xf32>
      %29 = vector.broadcast %28 : vector<16x1xf32> to vector<16x32xf32>
      %30 = arith.subf %24, %29 : vector<16x32xf32>
      %31 = arith.mulf %30, %30 : vector<16x32xf32>
      %cst_16 = arith.constant dense<0.000000e+00> : vector<16xf32>
      %32 = vector.multi_reduction <add>, %31, %cst_16 [1] : vector<16x32xf32> to vector<16xf32>
      %33 = vector.shape_cast %32 : vector<16xf32> to vector<16x1xf32>
      %cst_17 = arith.constant 3.200000e+01 : f32
      %34 = vector.broadcast %cst_17 : f32 to vector<16x1xf32>
      %35 = arith.divf %33, %34 : vector<16x1xf32>
      %36 = vector.broadcast %28 : vector<16x1xf32> to vector<16x32xf32>
      %37 = arith.subf %24, %36 : vector<16x32xf32>
      %cst_18 = arith.constant 9.99999974E-6 : f32
      %38 = vector.broadcast %cst_18 : f32 to vector<16x1xf32>
      %39 = arith.addf %35, %38 : vector<16x1xf32>
      %40 = math.rsqrt %39 : vector<16x1xf32>
      %41 = vector.broadcast %40 : vector<16x1xf32> to vector<16x32xf32>
      %42 = arith.mulf %37, %41 : vector<16x32xf32>
      %c0_19 = arith.constant 0 : index
      %c0_20 = arith.constant 0 : index
      %43 = vector.load %arg3[%c0_19, %c0_20] : memref<1x32xf32, #tpu.memory_space<vmem>>, vector<1x32xf32>
      %44 = vector.broadcast %43 : vector<1x32xf32> to vector<16x32xf32>
      %45 = arith.mulf %42, %44 : vector<16x32xf32>
      %c0_21 = arith.constant 0 : index
      %c0_22 = arith.constant 0 : index
      %46 = vector.load %arg4[%c0_21, %c0_22] : memref<1x32xf32, #tpu.memory_space<vmem>>, vector<1x32xf32>
      %47 = vector.broadcast %46 : vector<1x32xf32> to vector<16x32xf32>
      %48 = arith.addf %45, %47 : vector<16x32xf32>
      %49 = arith.truncf %48 : vector<16x32xf32> to vector<16x32xbf16>
      %c0_23 = arith.constant 0 : index
      %c0_24 = arith.constant 0 : index
      %50 = vector.load %arg8[%c0_23, %c0_24] : memref<16x32xbf16, #tpu.memory_space<vmem>>, vector<16x32xbf16>
      tpu.vector_store %arg8[%c0_23, %c0_24], %49 {strides = array<i32>} : memref<16x32xbf16, #tpu.memory_space<vmem>>, vector<16x32xbf16>,
    } else {
    }
    %c0 = arith.constant 0 : index
    %c0_1 = arith.constant 0 : index
    %3 = vector.load %arg8[%c0, %c0_1] : memref<16x32xbf16, #tpu.memory_space<vmem>>, vector<16x32xbf16>
    %c0_2 = arith.constant 0 : index
    %c0_3 = arith.constant 0 : index
    %4 = vector.load %arg5[%c0_2, %c0_3] : memref<32x128xbf16, #tpu.memory_space<vmem>>, vector<32x128xbf16>
    %cst = arith.constant dense<0.000000e+00> : vector<16x128xf32>
    %5 = tpu.matmul %3, %4, %cst {dimension_numbers = #tpu.dot_dimension_numbers<[1], [0], [0], [1], [0, 0, 1, 1], [], []>} : vector<16x32xbf16>, vector<32x128xbf16>, vector<16x128xf32> -> vector<16x128xf32>
    %c0_4 = arith.constant 0 : index
    %c0_5 = arith.constant 0 : index
    %6 = vector.load %arg6[%c0_4, %c0_5] : memref<1x128xf32, #tpu.memory_space<vmem>>, vector<1x128xf32>
    %7 = vector.broadcast %6 : vector<1x128xf32> to vector<16x128xf32>
    %8 = arith.addf %5, %7 : vector<16x128xf32>
    %9 = arith.mulf %8, %8 : vector<16x128xf32>
    %10 = arith.mulf %8, %9 : vector<16x128xf32>
    %cst_6 = arith.constant 4.471500e-02 : f32
    %11 = vector.broadcast %cst_6 : f32 to vector<16x128xf32>
    %12 = arith.mulf %11, %10 : vector<16x128xf32>
    %13 = arith.addf %8, %12 : vector<16x128xf32>
    %cst_7 = arith.constant 0.797884583 : f32
    %14 = vector.broadcast %cst_7 : f32 to vector<16x128xf32>
    %15 = arith.mulf %14, %13 : vector<16x128xf32>
    %16 = math.tanh %15 : vector<16x128xf32>
    %cst_8 = arith.constant 1.000000e+00 : f32
    %17 = vector.broadcast %cst_8 : f32 to vector<16x128xf32>
    %18 = arith.addf %17, %16 : vector<16x128xf32>
    %cst_9 = arith.constant 5.000000e-01 : f32
    %19 = vector.broadcast %cst_9 : f32 to vector<16x128xf32>
    %20 = arith.mulf %19, %18 : vector<16x128xf32>
    %21 = arith.mulf %8, %20 : vector<16x128xf32>
    %22 = arith.truncf %21 : vector<16x128xf32> to vector<16x128xbf16>
    %c0_10 = arith.constant 0 : index
    %c0_11 = arith.constant 0 : index
    %23 = vector.load %arg7[%c0_10, %c0_11] : memref<16x128xbf16, #tpu.memory_space<vmem>>, vector<16x128xbf16>
    tpu.vector_store %arg7[%c0_10, %c0_11], %22 {strides = array<i32>} : memref<16x128xbf16, #tpu.memory_space<vmem>>, vector<16x128xbf16>,
    return
  }
  func.func @transform_0(%arg0: i32, %arg1: i32) -> (i32, i32) {
    %c0_i32 = arith.constant 0 : i32
    %c0_i32_0 = arith.constant 0 : i32
    return %arg0, %c0_i32 : i32, i32
  }
  func.func @transform_1(%arg0: i32, %arg1: i32) -> (i32, i32) {
    %c0_i32 = arith.constant 0 : i32
    %c0_i32_0 = arith.constant 0 : i32
    %c0_i32_1 = arith.constant 0 : i32
    return %c0_i32, %c0_i32_0 : i32, i32
  }
  func.func @transform_2(%arg0: i32, %arg1: i32) -> (i32, i32) {
    %c0_i32 = arith.constant 0 : i32
    %c0_i32_0 = arith.constant 0 : i32
    %c0_i32_1 = arith.constant 0 : i32
    return %c0_i32, %c0_i32_0 : i32, i32
  }
  func.func @transform_3(%arg0: i32, %arg1: i32) -> (i32, i32) {
    %c0_i32 = arith.constant 0 : i32
    %c0_i32_0 = arith.constant 0 : i32
    return %c0_i32, %arg1 : i32, i32
  }
  func.func @transform_4(%arg0: i32, %arg1: i32) -> (i32, i32) {
    %c0_i32 = arith.constant 0 : i32
    %c0_i32_0 = arith.constant 0 : i32
    return %c0_i32, %arg1 : i32, i32
  }
  func.func @transform_5(%arg0: i32, %arg1: i32) -> (i32, i32) {
    %c0_i32 = arith.constant 0 : i32
    return %arg0, %arg1 : i32, i32
  }
}

module attributes {stable_mosaic.version = 11 : i64} {
  func.func @_matmul_residual_kernel(%arg0: i32, %arg1: i32, %arg2: i32, %arg3: memref<16x32xf32, #tpu.memory_space<vmem>>, %arg4: memref<16x128xbf16, #tpu.memory_space<vmem>>, %arg5: memref<128x32xbf16, #tpu.memory_space<vmem>>, %arg6: memref<1x32xf32, #tpu.memory_space<vmem>>, %arg7: memref<16x32xf32, #tpu.memory_space<vmem>>, %arg8: memref<16x32xf32, #tpu.memory_space<vmem>>) attributes {dimension_semantics = [#tpu.dimension_semantics<parallel>, #tpu.dimension_semantics<parallel>, #tpu.dimension_semantics<arbitrary>], iteration_bounds = array<i64: 1, 1, 1>, scalar_prefetch = 0 : i64, scratch_operands = 1 : i64, tpu.core_type = #tpu.core_type<tc>, window_params = [{transform_indices = @transform_0, window_bounds = array<i64: 16, 32>}, {transform_indices = @transform_1, window_bounds = array<i64: 16, 128>}, {transform_indices = @transform_2, window_bounds = array<i64: 128, 32>}, {transform_indices = @transform_3, window_bounds = array<i64: 1, 32>}, {transform_indices = @transform_4, window_bounds = array<i64: 16, 32>}]} {
    %c0_i32 = arith.constant 0 : i32
    %0 = arith.cmpi eq, %arg2, %c0_i32 : i32
    %1 = arith.extui %0 : i1 to i32
    %c0_i32_0 = arith.constant 0 : i32
    %2 = arith.cmpi ne, %1, %c0_i32_0 : i32
    scf.if %2 {
      %cst_10 = arith.constant 0.000000e+00 : f32
      %12 = vector.broadcast %cst_10 : f32 to vector<16x32xf32>
      %c0_11 = arith.constant 0 : index
      %c0_12 = arith.constant 0 : index
      %13 = vector.load %arg8[%c0_11, %c0_12] : memref<16x32xf32, #tpu.memory_space<vmem>>, vector<16x32xf32>
      tpu.vector_store %arg8[%c0_11, %c0_12], %12 {strides = array<i32>} : memref<16x32xf32, #tpu.memory_space<vmem>>, vector<16x32xf32>,
    } else {
    }
    %c0 = arith.constant 0 : index
    %c0_1 = arith.constant 0 : index
    %3 = vector.load %arg8[%c0, %c0_1] : memref<16x32xf32, #tpu.memory_space<vmem>>, vector<16x32xf32>
    %c0_2 = arith.constant 0 : index
    %c0_3 = arith.constant 0 : index
    %4 = vector.load %arg4[%c0_2, %c0_3] : memref<16x128xbf16, #tpu.memory_space<vmem>>, vector<16x128xbf16>
    %c0_4 = arith.constant 0 : index
    %c0_5 = arith.constant 0 : index
    %5 = vector.load %arg5[%c0_4, %c0_5] : memref<128x32xbf16, #tpu.memory_space<vmem>>, vector<128x32xbf16>
    %cst = arith.constant dense<0.000000e+00> : vector<16x32xf32>
    %6 = tpu.matmul %4, %5, %cst {dimension_numbers = #tpu.dot_dimension_numbers<[1], [0], [0], [1], [0, 0, 1, 1], [], []>} : vector<16x128xbf16>, vector<128x32xbf16>, vector<16x32xf32> -> vector<16x32xf32>
    %7 = arith.addf %3, %6 : vector<16x32xf32>
    %c0_6 = arith.constant 0 : index
    %c0_7 = arith.constant 0 : index
    %8 = vector.load %arg8[%c0_6, %c0_7] : memref<16x32xf32, #tpu.memory_space<vmem>>, vector<16x32xf32>
    tpu.vector_store %arg8[%c0_6, %c0_7], %7 {strides = array<i32>} : memref<16x32xf32, #tpu.memory_space<vmem>>, vector<16x32xf32>,
    %c0_i32_8 = arith.constant 0 : i32
    %9 = arith.cmpi eq, %arg2, %c0_i32_8 : i32
    %10 = arith.extui %9 : i1 to i32
    %c0_i32_9 = arith.constant 0 : i32
    %11 = arith.cmpi ne, %10, %c0_i32_9 : i32
    scf.if %11 {
      %c0_10 = arith.constant 0 : index
      %c0_11 = arith.constant 0 : index
      %12 = vector.load %arg3[%c0_10, %c0_11] : memref<16x32xf32, #tpu.memory_space<vmem>>, vector<16x32xf32>
      %c0_12 = arith.constant 0 : index
      %c0_13 = arith.constant 0 : index
      %13 = vector.load %arg8[%c0_12, %c0_13] : memref<16x32xf32, #tpu.memory_space<vmem>>, vector<16x32xf32>
      %14 = arith.addf %12, %13 : vector<16x32xf32>
      %c0_14 = arith.constant 0 : index
      %c0_15 = arith.constant 0 : index
      %15 = vector.load %arg6[%c0_14, %c0_15] : memref<1x32xf32, #tpu.memory_space<vmem>>, vector<1x32xf32>
      %16 = vector.broadcast %15 : vector<1x32xf32> to vector<16x32xf32>
      %17 = arith.addf %14, %16 : vector<16x32xf32>
      %c0_16 = arith.constant 0 : index
      %c0_17 = arith.constant 0 : index
      %18 = vector.load %arg7[%c0_16, %c0_17] : memref<16x32xf32, #tpu.memory_space<vmem>>, vector<16x32xf32>
      tpu.vector_store %arg7[%c0_16, %c0_17], %17 {strides = array<i32>} : memref<16x32xf32, #tpu.memory_space<vmem>>, vector<16x32xf32>,
    } else {
    }
    return
  }
  func.func @transform_0(%arg0: i32, %arg1: i32, %arg2: i32) -> (i32, i32) {
    %c0_i32 = arith.constant 0 : i32
    return %arg0, %arg1 : i32, i32
  }
  func.func @transform_1(%arg0: i32, %arg1: i32, %arg2: i32) -> (i32, i32) {
    %c0_i32 = arith.constant 0 : i32
    return %arg0, %arg2 : i32, i32
  }
  func.func @transform_2(%arg0: i32, %arg1: i32, %arg2: i32) -> (i32, i32) {
    %c0_i32 = arith.constant 0 : i32
    return %arg2, %arg1 : i32, i32
  }
  func.func @transform_3(%arg0: i32, %arg1: i32, %arg2: i32) -> (i32, i32) {
    %c0_i32 = arith.constant 0 : i32
    %c0_i32_0 = arith.constant 0 : i32
    return %c0_i32, %arg1 : i32, i32
  }
  func.func @transform_4(%arg0: i32, %arg1: i32, %arg2: i32) -> (i32, i32) {
    %c0_i32 = arith.constant 0 : i32
    return %arg0, %arg1 : i32, i32
  }
}

module attributes {stable_mosaic.version = 11 : i64} {
  func.func @_ln_matmul_kernel(%arg0: i32, %arg1: i32, %arg2: memref<16x32xf32, #tpu.memory_space<vmem>>, %arg3: memref<1x32xf32, #tpu.memory_space<vmem>>, %arg4: memref<1x32xf32, #tpu.memory_space<vmem>>, %arg5: memref<32x128xbf16, #tpu.memory_space<vmem>>, %arg6: memref<1x128xf32, #tpu.memory_space<vmem>>, %arg7: memref<16x128xf32, #tpu.memory_space<vmem>>, %arg8: memref<16x32xbf16, #tpu.memory_space<vmem>>) attributes {dimension_semantics = [#tpu.dimension_semantics<parallel>, #tpu.dimension_semantics<arbitrary>], iteration_bounds = array<i64: 1, 1>, scalar_prefetch = 0 : i64, scratch_operands = 1 : i64, tpu.core_type = #tpu.core_type<tc>, window_params = [{transform_indices = @transform_0, window_bounds = array<i64: 16, 32>}, {pipeline_mode = #tpu.pipeline_mode<synchronous>, transform_indices = @transform_1, window_bounds = array<i64: 1, 32>}, {pipeline_mode = #tpu.pipeline_mode<synchronous>, transform_indices = @transform_2, window_bounds = array<i64: 1, 32>}, {transform_indices = @transform_3, window_bounds = array<i64: 32, 128>}, {transform_indices = @transform_4, window_bounds = array<i64: 1, 128>}, {transform_indices = @transform_5, window_bounds = array<i64: 16, 128>}]} {
    %c0_i32 = arith.constant 0 : i32
    %0 = arith.cmpi eq, %arg1, %c0_i32 : i32
    %1 = arith.extui %0 : i1 to i32
    %c0_i32_0 = arith.constant 0 : i32
    %2 = arith.cmpi ne, %1, %c0_i32_0 : i32
    scf.if %2 {
      %c0_8 = arith.constant 0 : index
      %c0_9 = arith.constant 0 : index
      %10 = vector.load %arg2[%c0_8, %c0_9] : memref<16x32xf32, #tpu.memory_space<vmem>>, vector<16x32xf32>
      %cst_10 = arith.constant dense<0.000000e+00> : vector<16xf32>
      %11 = vector.multi_reduction <add>, %10, %cst_10 [1] : vector<16x32xf32> to vector<16xf32>
      %12 = vector.shape_cast %11 : vector<16xf32> to vector<16x1xf32>
      %cst_11 = arith.constant 3.200000e+01 : f32
      %13 = vector.broadcast %cst_11 : f32 to vector<16x1xf32>
      %14 = arith.divf %12, %13 : vector<16x1xf32>
      %15 = vector.broadcast %14 : vector<16x1xf32> to vector<16x32xf32>
      %16 = arith.subf %10, %15 : vector<16x32xf32>
      %17 = arith.mulf %16, %16 : vector<16x32xf32>
      %cst_12 = arith.constant dense<0.000000e+00> : vector<16xf32>
      %18 = vector.multi_reduction <add>, %17, %cst_12 [1] : vector<16x32xf32> to vector<16xf32>
      %19 = vector.shape_cast %18 : vector<16xf32> to vector<16x1xf32>
      %cst_13 = arith.constant 3.200000e+01 : f32
      %20 = vector.broadcast %cst_13 : f32 to vector<16x1xf32>
      %21 = arith.divf %19, %20 : vector<16x1xf32>
      %22 = vector.broadcast %14 : vector<16x1xf32> to vector<16x32xf32>
      %23 = arith.subf %10, %22 : vector<16x32xf32>
      %cst_14 = arith.constant 9.99999974E-6 : f32
      %24 = vector.broadcast %cst_14 : f32 to vector<16x1xf32>
      %25 = arith.addf %21, %24 : vector<16x1xf32>
      %26 = math.rsqrt %25 : vector<16x1xf32>
      %27 = vector.broadcast %26 : vector<16x1xf32> to vector<16x32xf32>
      %28 = arith.mulf %23, %27 : vector<16x32xf32>
      %c0_15 = arith.constant 0 : index
      %c0_16 = arith.constant 0 : index
      %29 = vector.load %arg3[%c0_15, %c0_16] : memref<1x32xf32, #tpu.memory_space<vmem>>, vector<1x32xf32>
      %30 = vector.broadcast %29 : vector<1x32xf32> to vector<16x32xf32>
      %31 = arith.mulf %28, %30 : vector<16x32xf32>
      %c0_17 = arith.constant 0 : index
      %c0_18 = arith.constant 0 : index
      %32 = vector.load %arg4[%c0_17, %c0_18] : memref<1x32xf32, #tpu.memory_space<vmem>>, vector<1x32xf32>
      %33 = vector.broadcast %32 : vector<1x32xf32> to vector<16x32xf32>
      %34 = arith.addf %31, %33 : vector<16x32xf32>
      %35 = arith.truncf %34 : vector<16x32xf32> to vector<16x32xbf16>
      %c0_19 = arith.constant 0 : index
      %c0_20 = arith.constant 0 : index
      %36 = vector.load %arg8[%c0_19, %c0_20] : memref<16x32xbf16, #tpu.memory_space<vmem>>, vector<16x32xbf16>
      tpu.vector_store %arg8[%c0_19, %c0_20], %35 {strides = array<i32>} : memref<16x32xbf16, #tpu.memory_space<vmem>>, vector<16x32xbf16>,
    } else {
    }
    %c0 = arith.constant 0 : index
    %c0_1 = arith.constant 0 : index
    %3 = vector.load %arg8[%c0, %c0_1] : memref<16x32xbf16, #tpu.memory_space<vmem>>, vector<16x32xbf16>
    %c0_2 = arith.constant 0 : index
    %c0_3 = arith.constant 0 : index
    %4 = vector.load %arg5[%c0_2, %c0_3] : memref<32x128xbf16, #tpu.memory_space<vmem>>, vector<32x128xbf16>
    %cst = arith.constant dense<0.000000e+00> : vector<16x128xf32>
    %5 = tpu.matmul %3, %4, %cst {dimension_numbers = #tpu.dot_dimension_numbers<[1], [0], [0], [1], [0, 0, 1, 1], [], []>} : vector<16x32xbf16>, vector<32x128xbf16>, vector<16x128xf32> -> vector<16x128xf32>
    %c0_4 = arith.constant 0 : index
    %c0_5 = arith.constant 0 : index
    %6 = vector.load %arg6[%c0_4, %c0_5] : memref<1x128xf32, #tpu.memory_space<vmem>>, vector<1x128xf32>
    %7 = vector.broadcast %6 : vector<1x128xf32> to vector<16x128xf32>
    %8 = arith.addf %5, %7 : vector<16x128xf32>
    %c0_6 = arith.constant 0 : index
    %c0_7 = arith.constant 0 : index
    %9 = vector.load %arg7[%c0_6, %c0_7] : memref<16x128xf32, #tpu.memory_space<vmem>>, vector<16x128xf32>
    tpu.vector_store %arg7[%c0_6, %c0_7], %8 {strides = array<i32>} : memref<16x128xf32, #tpu.memory_space<vmem>>, vector<16x128xf32>,
    return
  }
  func.func @transform_0(%arg0: i32, %arg1: i32) -> (i32, i32) {
    %c0_i32 = arith.constant 0 : i32
    %c0_i32_0 = arith.constant 0 : i32
    return %arg0, %c0_i32 : i32, i32
  }
  func.func @transform_1(%arg0: i32, %arg1: i32) -> (i32, i32) {
    %c0_i32 = arith.constant 0 : i32
    %c0_i32_0 = arith.constant 0 : i32
    %c0_i32_1 = arith.constant 0 : i32
    return %c0_i32, %c0_i32_0 : i32, i32
  }
  func.func @transform_2(%arg0: i32, %arg1: i32) -> (i32, i32) {
    %c0_i32 = arith.constant 0 : i32
    %c0_i32_0 = arith.constant 0 : i32
    %c0_i32_1 = arith.constant 0 : i32
    return %c0_i32, %c0_i32_0 : i32, i32
  }
  func.func @transform_3(%arg0: i32, %arg1: i32) -> (i32, i32) {
    %c0_i32 = arith.constant 0 : i32
    %c0_i32_0 = arith.constant 0 : i32
    return %c0_i32, %arg1 : i32, i32
  }
  func.func @transform_4(%arg0: i32, %arg1: i32) -> (i32, i32) {
    %c0_i32 = arith.constant 0 : i32
    %c0_i32_0 = arith.constant 0 : i32
    return %c0_i32, %arg1 : i32, i32
  }
  func.func @transform_5(%arg0: i32, %arg1: i32) -> (i32, i32) {
    %c0_i32 = arith.constant 0 : i32
    return %arg0, %arg1 : i32, i32
  }
}

</mosaic_0001>

<bundles_post_ra>
// kernel: text_gpt_forward.11
= control target key start
LH: loop header
LB: loop body
LE: loop exit
PB: predicated region body
PF: predicated region fallthrough
CT: control target
= control target key end

     0   :  { %vm27_vm0 = vcmask 261120   ;;  %v188_v15 = vmov 0.0   ;;  %vm189_vm1 = vmmov 0   ;;  %vm152_vm2 = vcmask 781312   ;;  %s253_s0 = inlined_call_operand.vmem [shape: f32[16,32], index: 0, kind: input, shape index: {}]   ;;  %s254_s3 = inlined_call_operand.vmem [shape: bf16[32,96], index: 3, kind: input, shape index: {}]   ;;  %s255_s1 = inlined_call_operand.vmem [shape: f32[1,32], index: 1, kind: input, shape index: {}]   ;;  %s256_s2 = inlined_call_operand.vmem [shape: f32[1,32], index: 2, kind: input, shape index: {}]   ;;  %s257_s4 = inlined_call_operand.vmem [shape: f32[1,96], index: 4, kind: input, shape index: {}]   ;;  %s258_s5 = inlined_call_operand.vmem [shape: bf16[16,96], index: 5, kind: output, shape index: {}]  }
   0x1   :  { %v25_v0 = vld [vmem:[%s253_s0] sm:$0xff]  ;;  %v26_v1 = vld [vmem:[%s253_s0 + $0x8] sm:$0xff]  ;;  %172 = vmatprep.subr.bf16.mxu0 %v188_v15  ;;  %176 = vmatprep.mubr.msk.bf16.mxu0 %vm189_vm1, %v188_v15 }
   0x2   :  { %v28_v2 = vsel %vm27_vm0, %v25_v0, 0.0  ;;  %v31_v3 = vsel %vm27_vm0, %v26_v1, 0.0  ;;  %v182_v14 = vld [vmem:[%s254_s3] sm:$0xff]   ;;  %v183_v16 = vld [vmem:[%s254_s3 + $0x8] sm:$0xff]  }
   0x3   :  { %29 = vadd.xlane.f32.xlu0 %v28_v2  ;;  %173 = vmatpush3.bf16.msra.mxu0 %v182_v14  ;;  %v159_v25 = vld [vmem:[%s255_s1] ss:$0 sm:$0xff] }
   0x4   :  { %174 = vmatprep.subr.bf16.mxu0 %v188_v15  ;;  %v160_v29 = vld [vmem:[%s256_s2] ss:$0 sm:$0xff] }
   0x5   :  { %v161_v35 = vld [vmem:[%s257_s4] ss:$0 sm:$0xff] }
   0x7   :  { %32 = vadd.xlane.f32.xlu0 %v31_v3  ;;  %175 = vmatpush3.bf16.msra.mxu0 %v183_v16 }
  0x90   :  { %v30_v4 = vpop.xlane.xlu0 %29 }
  0x91   :  { %v35_v5 = vmul.f32 0.03125, %v30_v4 }
  0x93   :  { %v37_v6 = vsub.f32 %v25_v0, %v35_v5 }
  0x94   :  { %v33_v7 = vpop.xlane.xlu0 %32 }
  0x95   :  { %v36_v8 = vmul.f32 0.03125, %v33_v7  ;;  %v39_v9 = vmul.f32 %v37_v6, %v37_v6 }
  0x97   :  { %v38_v10 = vsub.f32 %v26_v1, %v36_v8  ;;  %v41_v11 = vsel %vm27_vm0, %v39_v9, 0.0 }
  0x98   :  { %42 = vadd.xlane.f32.xlu1 %v41_v11 }
  0x99   :  { %v40_v12 = vmul.f32 %v38_v10, %v38_v10 }
  0x9b   :  { %v44_v13 = vsel %vm27_vm0, %v40_v12, 0.0 }
  0x9c   :  { %45 = vadd.xlane.f32.xlu1 %v44_v13 }
 0x125   :  { %v43_v17 = vpop.xlane.xlu1 %42 }
 0x126   :  { %v47_v18 = vmul.f32 0.03125, %v43_v17 }
 0x128   :  { %v49_v19 = vadd.f32 1e-05, %v47_v18 }
 0x129   :  { %v46_v20 = vpop.xlane.xlu1 %45 }
 0x12a   :  { %184 = vrsqrt.f32 %v49_v19  ;;  %v48_v21 = vmul.f32 0.03125, %v46_v20 }
 0x12c   :  { %v50_v22 = vadd.f32 1e-05, %v48_v21 }
 0x12e   :  { %186 = vrsqrt.f32 %v50_v22 }
 0x134   :  { %v185_v23 = vpop.eup %184 }
 0x135   :  { %v53_v24 = vmul.f32 %v185_v23, %v37_v6 }
 0x137   :  { %v62_v27 = vmul.f32 %v159_v25, %v53_v24 }
 0x138   :  { %v187_v26 = vpop.eup %186 }
 0x139   :  { %v54_v28 = vmul.f32 %v187_v26, %v38_v10  ;;  %v71_v31 = vadd.f32 %v160_v29, %v62_v27 }
 0x13b   :  { %v63_v30 = vmul.f32 %v159_v25, %v54_v28 }
 0x13d   :  { %v72_v32 = vadd.f32 %v160_v29, %v63_v30 }
 0x13f   :  { %v73_v33 = vpack.c.bf16 %v72_v32, %v71_v31 }
 0x141   :  { %74 = vst.msk [vmem:[#allocation2] sm:$0xff] %vm27_vm0, %v73_v33 }
 0x148   :  { %v75_v34 = vld [vmem:[#allocation2] sm:$0xff] }
 0x149   :  { %177 = vmatmul.mubr.msk.bf16.vlgmr.msra.gmra.mrb[0].mxu0 %vm27_vm0, %v75_v34 }
 0x21c   :  { %v137_v36 = vpop.f32.mrb[0].mxu0 }
 0x21d   :  { %v138_v37 = vadd.f32 %v161_v35, %v137_v36  ;;  %v178_v38 = vpop.f32.mrb[1].mxu0 }
 0x21e   :  { %v140_v39 = vpop.f32.mrb[2].mxu0 }
 0x21f   :  { %v167_v40 = vpack.c.bf16 %v138_v37, %v138_v37  ;;  %v141_v41 = vadd.f32 %v161_v35, %v140_v39  ;;  %v179_v42 = vpop.f32.mrb[3].mxu0 }
 0x221   :  { %153 = vst.msk [vmem:[%s258_s5] sm:$0xf] %vm152_vm2, %v167_v40  ;;  %v168_v43 = vpack.c.bf16 %v141_v41, %v141_v41 }
 0x223   :  { %154 = vst.msk [vmem:[%s258_s5 + $0x4] sm:$0xf] %vm152_vm2, %v168_v43 }

// kernel: text_gpt_forward.13
= control target key start
LH: loop header
LB: loop body
LE: loop exit
PB: predicated region body
PF: predicated region fallthrough
CT: control target
= control target key end

     0   :  { %vm22_vm0 = vcmask 261120   ;;  %v144_v0 = vmov 0.0   ;;  %vm145_vm1 = vmmov 0   ;;  %s202_s2 = inlined_call_operand.vmem [shape: bf16[32,32], index: 2, kind: input, shape index: {}]   ;;  %s203_s1 = inlined_call_operand.vmem [shape: bf16[16,32], index: 1, kind: input, shape index: {}]   ;;  %s204_s0 = inlined_call_operand.vmem [shape: f32[16,32], index: 0, kind: input, shape index: {}, may-alias: {0,4}]   ;;  %s205_s3 = inlined_call_operand.vmem [shape: f32[1,32], index: 3, kind: input, shape index: {}]   ;;  %s206_s4 = inlined_call_operand.vmem [shape: f32[16,32], index: 4, kind: output, shape index: {}, may-alias: {0,4}]  }
   0x1   :  { %131 = vmatprep.subr.bf16.mxu0 %v144_v0  ;;  %v141_v1 = vld [vmem:[%s202_s2] sm:$0xff]   ;;  %135 = vmatprep.mubr.msk.bf16.mxu0 %vm145_vm1, %v144_v0  ;;  %23 = vst.msk [vmem:[#allocation2] sm:$0xff] %vm22_vm0, %v144_v0  ;;  %24 = vst.msk [vmem:[#allocation2 + $0x8] sm:$0xff] %vm22_vm0, %v144_v0  ;;  %v142_v2 = vld [vmem:[%s202_s2 + $0x8] sm:$0xff]  }
   0x2   :  { %132 = vmatpush3.bf16.msra.mxu0 %v141_v1  ;;  %v143_v3 = vld [vmem:[%s203_s1] sm:$0xff]   ;;  %v103_v15 = vld [vmem:[%s204_s0 + $0x8] sm:$0xff] }
   0x3   :  { %133 = vmatprep.subr.bf16.mxu0 %v144_v0  ;;  %v102_v12 = vld [vmem:[%s204_s0] sm:$0xff] }
   0x4   :  { %v127_v14 = vld [vmem:[%s205_s3] ss:$0 sm:$0xff] }
   0x6   :  { %134 = vmatpush3.bf16.msra.mxu0 %v142_v2 }
   0x8   :  { %v25_v4 = vld [vmem:[#allocation2] sm:$0xff]  ;;  %v26_v6 = vld [vmem:[#allocation2 + $0x8] sm:$0xff] }
   0x9   :  { %136 = vmatmul.mubr.msk.bf16.vlgmr.msra.gmra.mrb[0].mxu0 %vm22_vm0, %v143_v3 }
  0xdc   :  { %v88_v5 = vpop.f32.mrb[0].mxu0 }
  0xdd   :  { %v95_v7 = vadd.f32 %v88_v5, %v25_v4  ;;  %v137_v8 = vpop.f32.mrb[1].mxu0 }
  0xde   :  { %v91_v9 = vpop.f32.mrb[2].mxu0 }
  0xdf   :  { %97 = vst.msk [vmem:[#allocation2] sm:$0xff] %vm22_vm0, %v95_v7  ;;  %v96_v10 = vadd.f32 %v91_v9, %v26_v6  ;;  %v138_v11 = vpop.f32.mrb[3].mxu0 }
  0xe1   :  { %98 = vst.msk [vmem:[#allocation2 + $0x8] sm:$0xff] %vm22_vm0, %v96_v10 }
  0xe6   :  { %v104_v13 = vld [vmem:[#allocation2] sm:$0xff] }
  0xe7   :  { %v106_v16 = vadd.f32 %v104_v13, %v102_v12 }
  0xe8   :  { %v105_v17 = vld [vmem:[#allocation2 + $0x8] sm:$0xff] }
  0xe9   :  { %v115_v18 = vadd.f32 %v127_v14, %v106_v16  ;;  %v107_v19 = vadd.f32 %v105_v17, %v103_v15 }
  0xeb   :  { %117 = vst.msk [vmem:[%s206_s4] sm:$0xff] %vm22_vm0, %v115_v18  ;;  %v116_v20 = vadd.f32 %v127_v14, %v107_v19 }
  0xed   :  { %118 = vst.msk [vmem:[%s206_s4 + $0x8] sm:$0xff] %vm22_vm0, %v116_v20 }

// kernel: text_gpt_forward.12
= control target key start
LH: loop header
LB: loop body
LE: loop exit
PB: predicated region body
PF: predicated region fallthrough
CT: control target
= control target key end

     0   :  { %s763_s12 = smov 0   ;;  %s765_s13 = smov 0   ;;  %s819_s0 = inlined_call_operand.vmem [shape: bf16[8,8,8], index: 0, kind: input, shape index: {}]   ;;  %s820_s1 = inlined_call_operand.vmem [shape: bf16[8,8,8], index: 1, kind: input, shape index: {}]   ;;  %s821_s2 = inlined_call_operand.vmem [shape: bf16[8,8,8], index: 2, kind: input, shape index: {}]   ;;  %s822_s3 = inlined_call_operand.vmem [shape: bf16[8,8,8], index: 3, kind: output, shape index: {}]  }
   0x1   :  { %s767_s14 = smov 0  }
   0x2 LB: > { %s25_s15 = sadd.s32 1, %s733_s13  ;;  %p649_p0 = scmp.ge.s32.totalorder %s737_s14, 1  ;;  %s737_s14 = sphi %s767_s14, %s13_s14   ;;  %s733_s13 = sphi %s765_s13, %s824_s13   ;;  %s729_s12 = sphi %s763_s12, %s823_s12  }
   0x3   : > { %p27_p1 = scmp.ge.s32.totalorder %s25_s15, 8  ;;  %p173_p2 = scmp.lt.s32.totalorder %s737_s14, 9 }
   0x5   : > { %s826_s15 = smov (%p27_p1, %s25_s15), 0  ;;  %p174_p3 = pnand %p649_p0, %p173_p2 }
   0x6   : > { %p209_p4 = scmp.lt.s32.totalorder (!%p174_p3), %s729_s12, 7  ;;  %vm235_vm0 = vcmask (!%p174_p3), 64512   ;;  %v739_v0 = vmov (!%p174_p3), 0.0   ;;  %vm740_vm1 = vmmov (!%p174_p3), 0   ;;  %vm232_vm2 = vcmask (!%p174_p3), 7168  }
   0x7   : > { %177 = sbr.rel (%p174_p3) target bundleno = 824 (0x338), region = 32  ;;  %667 = vmatprep.subr.bf16.mxu0 (!%p174_p3), %v739_v0  ;;  %236 = vst.msk [vmem:[#allocation4] sm:$0xff] (!%p174_p3), %vm235_vm0, %v739_v0  ;;  %669 = vmatprep.mubr.msk.bf16.mxu0 (!%p174_p3), %vm740_vm1, %v739_v0  ;;  %v741_v4 = vmov (!%p174_p3), -1e+30   ;;  %v435_v5 = vlaneseq (!%p174_p3)  ;;  %v742_v14 = vmov (!%p174_p3), 0   ;;  %vm475_vm4 = vcmask (!%p174_p3), 1043456  }
   0x8   : > { %673 = vmatprep.subr.bf16.mxu1 (!%p174_p3), %v739_v0  ;;  %675 = vmatprep.mubr.msk.bf16.mxu1 (!%p174_p3), %vm740_vm1, %v739_v0  ;;  %233 = vst.msk [vmem:[#allocation2] sm:$0xff] (!%p174_p3), %vm232_vm2, %v741_v4  ;;  %234 = vst.msk [vmem:[#allocation3] sm:$0xff] (!%p174_p3), %vm232_vm2, %v739_v0  ;;  %vm532_vm5 = vcmask (!%p174_p3), 60416  }
   0x9   : > { %v436_v6 = vshrl.u32 (!%p174_p3), %v435_v5, 7  ;;  %v438_v7 = vand.u32 (!%p174_p3), 127, %v435_v5  ;;  %707 = vset.pattern.permute.xlu0 (!%p174_p3), %v742_v14  ;;  %708 = vset.pattern.permute.xlu1 (!%p174_p3), %v742_v14 }
   0xb   : > { %vm439_vm3 = vcmp.le.s32.totalorder (!%p174_p3), %v438_v7, %v436_v6 }
   0xe   : > { %s828_s12 = smov (!%p209_p4, %s729_s12), 7  ;;  %v464_v35 = vld [vmem:[#allocation4] sm:$0xff] }
   0xf   : > { %s782_s16 = sshll.u32 %s828_s12, 2  ;;  %v441_v15 = vld [vmem:[#allocation2] sm:$0xff]  ;;  %v457_v29 = vld [vmem:[#allocation3] sm:$0xff] }
  0x10   : > { %s219_s19 = scalar_lea.vmem %s820_s1, %s782_s16  ;;  %s215_s22 = scalar_lea.vmem %s819_s0, %s782_s16 }
  0x11   : > { %v385_v1 = vld [vmem:[%s219_s19] sm:$0xf]  ;;  %s223_s25 = scalar_lea.vmem %s821_s2, %s782_s16  ;;  %s230_s28 = scalar_lea.vmem %s822_s3, %s782_s16 }
  0x12   : > { %v393_v2 = vsel %vm235_vm0, %v385_v1, 0  ;;  %v237_v3 = vld [vmem:[%s215_s22] sm:$0xf] }
  0x13   : > { %668 = vmatpush3.bf16.xpose.msra.mxu0 %v393_v2  ;;  %v388_v19 = vld [vmem:[%s223_s25] sm:$0xf] }
  0x14   : > { %v477_v20 = vsel %vm475_vm4, %v388_v19, 0 }
  0x15   : > { %674 = vmatpush3.bf16.msra.mxu1 %v477_v20 }
  0x1a   : > { %670 = vmatmul.mubr.msk.bf16.vlgmr.msra.gmra.mrb[0].mxu0 %vm235_vm0, %v237_v3 }
  0xed   : > { %v429_v8 = vpop.f32.mrb[0].mxu0 }
  0xee   : > { %v440_v9 = vsel %vm439_vm3, %v429_v8, -1e+30  ;;  %v671_v10 = vpop.f32.mrb[1].mxu0 }
  0xef   : > { %v432_v11 = vpop.f32.mrb[2].mxu0  ;;  %v442_v12 = vsel %vm235_vm0, %v440_v9, -inf }
  0xf0   : > { %443 = vmax.xlane.f32.xlu0 %v442_v12  ;;  %v672_v13 = vpop.f32.mrb[3].mxu0 }
 0x17d   : > { %v444_v16 = vpop.xlane.xlu0 %443 }
 0x17e   : > { %v445_v17 = vmax.f32 %v441_v15, %v444_v16 }
 0x180   : > { %v446_v18 = vsub.f32 %v441_v15, %v445_v17  ;;  %521 = vst.msk [vmem:[#allocation2] sm:$0xff] %vm232_vm2, %v445_v17  ;;  %451 = vperm.xlu0 %707, %v445_v17  }
 0x182   : > { %v447_v27 = vmul.f32 1.442695, %v446_v18 }
 0x1ff   : > { %v452_v21 = vpop.permute.xlu0 %451 }
 0x200   : > { %v454_v22 = vsub.f32 %v440_v9, %v452_v21 }
 0x202   : > { %v455_v23 = vmul.f32 1.442695, %v454_v22 }
 0x204   : > { %709 = vpow2.f32 %v455_v23 }
 0x205   : > { %711 = vpow2.f32 %v447_v27 }
 0x20e   : > { %v710_v24 = vpop.eup %709 }
 0x20f   : > { %v459_v25 = vsel %vm235_vm0, %v710_v24, 0.0  ;;  %v471_v26 = vpack.c.bf16 %v710_v24, %v710_v24  ;;  %v712_v28 = vpop.eup %711 }
 0x210   : > { %460 = vadd.xlane.f32.xlu1 %v459_v25  ;;  %v458_v30 = vmul.f32 %v712_v28, %v457_v29 }
 0x211   : > { %676 = vmatmul.mubr.msk.bf16.vlgmr.msra.gmra.mrb[0].mxu1 %vm235_vm0, %v471_v26 }
 0x221   : > { %467 = vperm.xlu1 %708, %v712_v28  }
 0x29d   : > { %v461_v31 = vpop.xlane.xlu1 %460 }
 0x29e   : > { %v462_v32 = vadd.f32 %v461_v31, %v458_v30 }
 0x2a0   : > { %463 = vst.msk [vmem:[#allocation3] sm:$0xff] %vm232_vm2, %v462_v32 }
 0x2a1   : > { %v468_v36 = vpop.permute.xlu1 %467 }
 0x2a2   : > { %v470_v37 = vmul.f32 %v468_v36, %v464_v35 }
 0x2a7   : > { %v523_v33 = vld [vmem:[#allocation3] sm:$0xff] }
 0x2a8   : > { %713 = vrcp.f32 %v523_v33 }
 0x2b2   : > { %v714_v34 = vpop.eup %713 }
 0x2b3   : > { %527 = vperm.xlu1 %708, %v714_v34  }
 0x2e4   : > { %v513_v38 = vpop.f32.mrb[0].mxu1 }
 0x2e5   : > { %v519_v39 = vadd.f32 %v513_v38, %v470_v37  ;;  %v677_v40 = vpop.f32.mrb[1].mxu1 }
 0x2e6   : > { %v516_v41 = vpop.f32.mrb[2].mxu1 }
 0x2e7   : > { %520 = vst.msk [vmem:[#allocation4] sm:$0xff] %vm235_vm0, %v519_v39  ;;  %v678_v42 = vpop.f32.mrb[3].mxu1 }
 0x2ee   : > { %v522_v43 = vld [vmem:[#allocation4] sm:$0xff] }
 0x332   : > { %v528_v44 = vpop.permute.xlu1 %527 }
 0x333   : > { %v530_v45 = vmul.f32 %v528_v44, %v522_v43 }
 0x335   : > { %v531_v46 = vpack.c.bf16 %v530_v45, %v530_v45 }
 0x337   : > { %533 = vst.msk [vmem:[%s230_s28] sm:$0xf] %vm532_vm5, %v531_v46 }
 0x338 PF: > { %s13_s14 = sadd.s32 1, %s737_s14   ;;  %s823_s12 = smov %s733_s13 }
 0x339   : > { %p10_p5 = scmp.ge.s32.totalorder %s13_s14, 10   ;;  %s824_s13 = smov %s826_s15 }
 0x33b   :  { %12 = sbr.rel (!%p10_p5) target bundleno = 2 (0x2), region = 90 }

// kernel: text_gpt_forward.14
= control target key start
LH: loop header
LB: loop body
LE: loop exit
PB: predicated region body
PF: predicated region fallthrough
CT: control target
= control target key end

     0   :  { %vm27_vm0 = vcmask 261120   ;;  %v214_v15 = vmov 0.0   ;;  %vm215_vm1 = vmmov 0   ;;  %s276_s0 = inlined_call_operand.vmem [shape: f32[16,32], index: 0, kind: input, shape index: {}]   ;;  %s277_s3 = inlined_call_operand.vmem [shape: bf16[32,128], index: 3, kind: input, shape index: {}]   ;;  %s278_s1 = inlined_call_operand.vmem [shape: f32[1,32], index: 1, kind: input, shape index: {}]   ;;  %s279_s2 = inlined_call_operand.vmem [shape: f32[1,32], index: 2, kind: input, shape index: {}]   ;;  %s280_s4 = inlined_call_operand.vmem [shape: f32[1,128], index: 4, kind: input, shape index: {}]   ;;  %s281_s5 = inlined_call_operand.vmem [shape: bf16[16,128], index: 5, kind: output, shape index: {}]  }
   0x1   :  { %v25_v0 = vld [vmem:[%s276_s0] sm:$0xff]  ;;  %v26_v1 = vld [vmem:[%s276_s0 + $0x8] sm:$0xff]  ;;  %194 = vmatprep.subr.bf16.mxu0 %v214_v15  ;;  %198 = vmatprep.mubr.msk.bf16.mxu0 %vm215_vm1, %v214_v15 }
   0x2   :  { %v28_v2 = vsel %vm27_vm0, %v25_v0, 0.0  ;;  %v31_v3 = vsel %vm27_vm0, %v26_v1, 0.0  ;;  %v204_v14 = vld [vmem:[%s277_s3] sm:$0xff]   ;;  %v205_v16 = vld [vmem:[%s277_s3 + $0x8] sm:$0xff]  }
   0x3   :  { %29 = vadd.xlane.f32.xlu0 %v28_v2  ;;  %195 = vmatpush3.bf16.msra.mxu0 %v204_v14  ;;  %v176_v25 = vld [vmem:[%s278_s1] ss:$0 sm:$0xff] }
   0x4   :  { %196 = vmatprep.subr.bf16.mxu0 %v214_v15  ;;  %v177_v29 = vld [vmem:[%s279_s2] ss:$0 sm:$0xff] }
   0x5   :  { %v178_v35 = vld [vmem:[%s280_s4] ss:$0 sm:$0xff] }
   0x7   :  { %32 = vadd.xlane.f32.xlu0 %v31_v3  ;;  %197 = vmatpush3.bf16.msra.mxu0 %v205_v16 }
  0x90   :  { %v30_v4 = vpop.xlane.xlu0 %29 }
  0x91   :  { %v35_v5 = vmul.f32 0.03125, %v30_v4 }
  0x93   :  { %v37_v6 = vsub.f32 %v25_v0, %v35_v5 }
  0x94   :  { %v33_v7 = vpop.xlane.xlu0 %32 }
  0x95   :  { %v36_v8 = vmul.f32 0.03125, %v33_v7  ;;  %v39_v9 = vmul.f32 %v37_v6, %v37_v6 }
  0x97   :  { %v38_v10 = vsub.f32 %v26_v1, %v36_v8  ;;  %v41_v11 = vsel %vm27_vm0, %v39_v9, 0.0 }
  0x98   :  { %42 = vadd.xlane.f32.xlu1 %v41_v11 }
  0x99   :  { %v40_v12 = vmul.f32 %v38_v10, %v38_v10 }
  0x9b   :  { %v44_v13 = vsel %vm27_vm0, %v40_v12, 0.0 }
  0x9c   :  { %45 = vadd.xlane.f32.xlu1 %v44_v13 }
 0x125   :  { %v43_v17 = vpop.xlane.xlu1 %42 }
 0x126   :  { %v47_v18 = vmul.f32 0.03125, %v43_v17 }
 0x128   :  { %v49_v19 = vadd.f32 1e-05, %v47_v18 }
 0x129   :  { %v46_v20 = vpop.xlane.xlu1 %45 }
 0x12a   :  { %206 = vrsqrt.f32 %v49_v19  ;;  %v48_v21 = vmul.f32 0.03125, %v46_v20 }
 0x12c   :  { %v50_v22 = vadd.f32 1e-05, %v48_v21 }
 0x12e   :  { %208 = vrsqrt.f32 %v50_v22 }
 0x134   :  { %v207_v23 = vpop.eup %206 }
 0x135   :  { %v53_v24 = vmul.f32 %v207_v23, %v37_v6 }
 0x137   :  { %v62_v27 = vmul.f32 %v176_v25, %v53_v24 }
 0x138   :  { %v209_v26 = vpop.eup %208 }
 0x139   :  { %v54_v28 = vmul.f32 %v209_v26, %v38_v10  ;;  %v71_v31 = vadd.f32 %v177_v29, %v62_v27 }
 0x13b   :  { %v63_v30 = vmul.f32 %v176_v25, %v54_v28 }
 0x13d   :  { %v72_v32 = vadd.f32 %v177_v29, %v63_v30 }
 0x13f   :  { %v73_v33 = vpack.c.bf16 %v72_v32, %v71_v31 }
 0x141   :  { %74 = vst.msk [vmem:[#allocation2] sm:$0xff] %vm27_vm0, %v73_v33 }
 0x148   :  { %v75_v34 = vld [vmem:[#allocation2] sm:$0xff] }
 0x149   :  { %199 = vmatmul.mubr.msk.bf16.vlgmr.msra.gmra.mrb[0].mxu0 %vm27_vm0, %v75_v34 }
 0x21c   :  { %v137_v36 = vpop.f32.mrb[0].mxu0 }
 0x21d   :  { %v138_v37 = vadd.f32 %v178_v35, %v137_v36  ;;  %v200_v38 = vpop.f32.mrb[1].mxu0 }
 0x21e   :  { %v140_v39 = vpop.f32.mrb[2].mxu0 }
 0x21f   :  { %v144_v40 = vmul.f32 %v138_v37, %v138_v37  ;;  %v141_v41 = vadd.f32 %v178_v35, %v140_v39  ;;  %v201_v42 = vpop.f32.mrb[3].mxu0 }
 0x221   :  { %v146_v43 = vmul.f32 %v144_v40, %v138_v37  ;;  %v145_v44 = vmul.f32 %v141_v41, %v141_v41 }
 0x223   :  { %v148_v45 = vmul.f32 0.044715, %v146_v43  ;;  %v147_v46 = vmul.f32 %v145_v44, %v141_v41 }
 0x225   :  { %v150_v47 = vadd.f32 %v148_v45, %v138_v37  ;;  %v149_v48 = vmul.f32 0.044715, %v147_v46 }
 0x227   :  { %v152_v49 = vmul.f32 0.7978846, %v150_v47  ;;  %v151_v50 = vadd.f32 %v149_v48, %v141_v41 }
 0x229   :  { %210 = vtanh.f32 %v152_v49  ;;  %v153_v51 = vmul.f32 0.7978846, %v151_v50 }
 0x22b   :  { %212 = vtanh.f32 %v153_v51 }
 0x233   :  { %v211_v52 = vpop.eup %210 }
 0x234   :  { %v156_v53 = vadd.f32 1.0, %v211_v52 }
 0x235   :  { %v213_v54 = vpop.eup %212 }
 0x236   :  { %v158_v55 = vmul.f32 0.5, %v156_v53  ;;  %v157_v56 = vadd.f32 1.0, %v213_v54 }
 0x238   :  { %v159_v57 = vmul.f32 0.5, %v157_v56  ;;  %v160_v58 = vmul.f32 %v158_v55, %v138_v37 }
 0x23a   :  { %v161_v59 = vmul.f32 %v159_v57, %v141_v41 }
 0x23c   :  { %v189_v60 = vpack.c.bf16 %v161_v59, %v160_v58 }
 0x23e   :  { %190 = vst [vmem:[%s281_s5] sm:$0xff] %v189_v60  }

// kernel: text_gpt_forward.15
= control target key start
LH: loop header
LB: loop body
LE: loop exit
PB: predicated region body
PF: predicated region fallthrough
CT: control target
= control target key end

     0   :  { %vm22_vm0 = vcmask 261120   ;;  %v219_v0 = vmov 0.0   ;;  %vm220_vm1 = vmmov 0   ;;  %s294_s2 = inlined_call_operand.vmem [shape: bf16[128,32], index: 2, kind: input, shape index: {}]   ;;  %s295_s1 = inlined_call_operand.vmem [shape: bf16[16,128], index: 1, kind: input, shape index: {}]   ;;  %s296_s0 = inlined_call_operand.vmem [shape: f32[16,32], index: 0, kind: input, shape index: {}, may-alias: {0,4}]   ;;  %s297_s3 = inlined_call_operand.vmem [shape: f32[1,32], index: 3, kind: input, shape index: {}]   ;;  %s298_s4 = inlined_call_operand.vmem [shape: f32[16,32], index: 4, kind: output, shape index: {}, may-alias: {0,4}]  }
   0x1   :  { %188 = vmatprep.subr.bf16.mxu0 %v219_v0  ;;  %v210_v1 = vld [vmem:[%s294_s2] sm:$0xff]   ;;  %204 = vmatprep.mubr.msk.bf16.mxu0 %vm220_vm1, %v219_v0  ;;  %23 = vst.msk [vmem:[#allocation2] sm:$0xff] %vm22_vm0, %v219_v0  ;;  %24 = vst.msk [vmem:[#allocation2 + $0x8] sm:$0xff] %vm22_vm0, %v219_v0  ;;  %v211_v2 = vld [vmem:[%s294_s2 + $0x8] sm:$0xff]  }
   0x2   :  { %189 = vmatpush3.bf16.msra.mxu0 %v210_v1  ;;  %v212_v3 = vld [vmem:[%s294_s2 + $0x10] sm:$0xff]   ;;  %v213_v4 = vld [vmem:[%s294_s2 + $0x18] sm:$0xff]   ;;  %v214_v5 = vld [vmem:[%s294_s2 + $0x20] sm:$0xff]  }
   0x3   :  { %190 = vmatprep.subr.bf16.mxu0 %v219_v0  ;;  %v215_v6 = vld [vmem:[%s294_s2 + $0x28] sm:$0xff]   ;;  %v216_v7 = vld [vmem:[%s294_s2 + $0x30] sm:$0xff]   ;;  %v217_v8 = vld [vmem:[%s294_s2 + $0x38] sm:$0xff]  }
   0x4   :  { %v218_v9 = vld [vmem:[%s295_s1] sm:$0xff]   ;;  %v149_v19 = vld [vmem:[%s296_s0 + $0x8] sm:$0xff] }
   0x5   :  { %v148_v18 = vld [vmem:[%s296_s0] sm:$0xff] }
   0x6   :  { %191 = vmatpush3.bf16.msra.mxu0 %v211_v2  ;;  %v178_v21 = vld [vmem:[%s297_s3] ss:$0 sm:$0xff] }
   0x7   :  { %192 = vmatprep.subr.bf16.mxu0 %v219_v0 }
   0x8   :  { %v25_v10 = vld [vmem:[#allocation2] sm:$0xff]  ;;  %v26_v12 = vld [vmem:[#allocation2 + $0x8] sm:$0xff] }
   0xa   :  { %193 = vmatpush3.bf16.msra.mxu0 %v212_v3 }
   0xb   :  { %194 = vmatprep.subr.bf16.mxu0 %v219_v0 }
   0xe   :  { %195 = vmatpush3.bf16.msra.mxu0 %v213_v4 }
   0xf   :  { %196 = vmatprep.subr.bf16.mxu0 %v219_v0 }
  0x12   :  { %197 = vmatpush3.bf16.msra.mxu0 %v214_v5 }
  0x13   :  { %198 = vmatprep.subr.bf16.mxu0 %v219_v0 }
  0x16   :  { %199 = vmatpush3.bf16.msra.mxu0 %v215_v6 }
  0x17   :  { %200 = vmatprep.subr.bf16.mxu0 %v219_v0 }
  0x1a   :  { %201 = vmatpush3.bf16.msra.mxu0 %v216_v7 }
  0x1b   :  { %202 = vmatprep.subr.bf16.mxu0 %v219_v0 }
  0x1e   :  { %203 = vmatpush3.bf16.msra.mxu0 %v217_v8 }
  0x21   :  { %205 = vmatmul.mubr.bf16.vlgmr.msra.gmra.mrb[0].mxu0 %v218_v9 }
  0xf4   :  { %v133_v11 = vpop.f32.mrb[0].mxu0 }
  0xf5   :  { %v140_v13 = vadd.f32 %v133_v11, %v25_v10  ;;  %v206_v14 = vpop.f32.mrb[1].mxu0 }
  0xf6   :  { %v136_v15 = vpop.f32.mrb[2].mxu0 }
  0xf7   :  { %143 = vst.msk [vmem:[#allocation2] sm:$0xff] %vm22_vm0, %v140_v13  ;;  %v141_v16 = vadd.f32 %v136_v15, %v26_v12  ;;  %v207_v17 = vpop.f32.mrb[3].mxu0 }
  0xf9   :  { %144 = vst.msk [vmem:[#allocation2 + $0x8] sm:$0xff] %vm22_vm0, %v141_v16 }
  0xfe   :  { %v150_v20 = vld [vmem:[#allocation2] sm:$0xff] }
  0xff   :  { %v152_v22 = vadd.f32 %v150_v20, %v148_v18 }
 0x100   :  { %v151_v23 = vld [vmem:[#allocation2 + $0x8] sm:$0xff] }
 0x101   :  { %v161_v24 = vadd.f32 %v178_v21, %v152_v22  ;;  %v153_v25 = vadd.f32 %v151_v23, %v149_v19 }
 0x103   :  { %163 = vst.msk [vmem:[%s298_s4] sm:$0xff] %vm22_vm0, %v161_v24  ;;  %v162_v26 = vadd.f32 %v178_v21, %v153_v25 }
 0x105   :  { %164 = vst.msk [vmem:[%s298_s4 + $0x8] sm:$0xff] %vm22_vm0, %v162_v26 }

// kernel: text_gpt_forward.21
= control target key start
LH: loop header
LB: loop body
LE: loop exit
PB: predicated region body
PF: predicated region fallthrough
CT: control target
= control target key end

     0   :  { %vm28_vm0 = vcmask 261120   ;;  %s289_s0 = inlined_call_operand.vmem [shape: f32[16,32], index: 0, kind: input, shape index: {}]   ;;  %s290_s1 = inlined_call_operand.vmem [shape: f32[1,32], index: 1, kind: input, shape index: {}]   ;;  %s291_s2 = inlined_call_operand.vmem [shape: f32[1,32], index: 2, kind: input, shape index: {}]   ;;  %s292_s3 = inlined_call_operand.vmem [shape: bf16[32,128], index: 3, kind: input, shape index: {}]   ;;  %s293_s4 = inlined_call_operand.vmem [shape: f32[1,128], index: 4, kind: input, shape index: {}]   ;;  %s294_s5 = inlined_call_operand.hbm [shape: f32[16,128], index: 5, kind: output, shape index: {}]  }
   0x1   :  { %v26_v0 = vld [vmem:[%s289_s0] sm:$0xff]  ;;  %v27_v1 = vld [vmem:[%s289_s0 + $0x8] sm:$0xff] }
   0x2   :  { %v29_v2 = vsel %vm28_vm0, %v26_v0, 0.0 }
   0x3   :  { %30 = vadd.xlane.f32.xlu0 %v29_v2 }
   0x4   :  { %10 = vsyncpa [#allocation4], 0  ;;  %v32_v3 = vsel %vm28_vm0, %v27_v1, 0.0  ;;  %v185_v14 = vld [vmem:[%s292_s3] sm:$0xff]   ;;  %v215_v15 = vmov 0.0   ;;  %v186_v16 = vld [vmem:[%s292_s3 + $0x8] sm:$0xff]  }
   0x5   :  { %172 = vmatprep.subr.bf16.mxu0 %v215_v15  ;;  %vm216_vm1 = vmmov 0   ;;  %v163_v25 = vld [vmem:[%s290_s1] ss:$0 sm:$0xff]  ;;  %s217_s1 = smov [#allocation3]  }
   0x6   :  { %173 = vmatpush3.bf16.msra.mxu0 %v185_v14  ;;  %176 = vmatprep.mubr.msk.bf16.mxu0 %vm216_vm1, %v215_v15  ;;  %v164_v29 = vld [vmem:[%s291_s2] ss:$0 sm:$0xff]  ;;  %s152_s30 = sshll.u32 %s217_s1, 4  ;;  %s153_s30 = int_to_ptr.vmem [resolvable:$true] %s152_s30 }
   0x7   :  { %33 = vadd.xlane.f32.xlu0 %v32_v3  ;;  %174 = vmatprep.subr.bf16.mxu0 %v215_v15  ;;  %v165_v35 = vld [vmem:[%s293_s4] ss:$0 sm:$0xff]  ;;  %s191_s2 = scalar_lea.vmem %s153_s30, 256  ;;  %p196_p1 = scmp.lt.s32.totalorder %s153_s30, %s153_s30 }
   0x8   :  { %p192_p0 = scmp.ne.s32.totalorder %s153_s30, %s191_s2  ;;  %p197_p2 = scmp.lt.s32.totalorder %s191_s2, %s191_s2 }
   0xa   :  { %175 = vmatpush3.bf16.msra.mxu0 %v186_v16  ;;  %p198_p3 = por %p197_p2, %p196_p1 }
   0xc   :  { %p199_p4 = pnand %p198_p3, %p192_p0 }
  0x90   :  { %v31_v4 = vpop.xlane.xlu0 %30 }
  0x91   :  { %v36_v5 = vmul.f32 0.03125, %v31_v4 }
  0x93   :  { %v38_v6 = vsub.f32 %v26_v0, %v36_v5 }
  0x94   :  { %v34_v7 = vpop.xlane.xlu0 %33 }
  0x95   :  { %v37_v8 = vmul.f32 0.03125, %v34_v7  ;;  %v40_v9 = vmul.f32 %v38_v6, %v38_v6 }
  0x97   :  { %v39_v10 = vsub.f32 %v27_v1, %v37_v8  ;;  %v42_v11 = vsel %vm28_vm0, %v40_v9, 0.0 }
  0x98   :  { %43 = vadd.xlane.f32.xlu1 %v42_v11 }
  0x99   :  { %v41_v12 = vmul.f32 %v39_v10, %v39_v10 }
  0x9b   :  { %v45_v13 = vsel %vm28_vm0, %v41_v12, 0.0 }
  0x9c   :  { %46 = vadd.xlane.f32.xlu1 %v45_v13 }
 0x125   :  { %v44_v17 = vpop.xlane.xlu1 %43 }
 0x126   :  { %v48_v18 = vmul.f32 0.03125, %v44_v17 }
 0x128   :  { %v50_v19 = vadd.f32 1e-05, %v48_v18 }
 0x129   :  { %v47_v20 = vpop.xlane.xlu1 %46 }
 0x12a   :  { %187 = vrsqrt.f32 %v50_v19  ;;  %v49_v21 = vmul.f32 0.03125, %v47_v20 }
 0x12c   :  { %v51_v22 = vadd.f32 1e-05, %v49_v21 }
 0x12e   :  { %189 = vrsqrt.f32 %v51_v22 }
 0x134   :  { %v188_v23 = vpop.eup %187 }
 0x135   :  { %v54_v24 = vmul.f32 %v188_v23, %v38_v6 }
 0x137   :  { %v63_v27 = vmul.f32 %v163_v25, %v54_v24 }
 0x138   :  { %v190_v26 = vpop.eup %189 }
 0x139   :  { %v55_v28 = vmul.f32 %v190_v26, %v39_v10  ;;  %v72_v31 = vadd.f32 %v164_v29, %v63_v27 }
 0x13b   :  { %v64_v30 = vmul.f32 %v163_v25, %v55_v28 }
 0x13d   :  { %v73_v32 = vadd.f32 %v164_v29, %v64_v30 }
 0x13f   :  { %v74_v33 = vpack.c.bf16 %v73_v32, %v72_v31 }
 0x141   :  { %75 = vst.msk [vmem:[#allocation2] sm:$0xff] %vm28_vm0, %v74_v33 }
 0x148   :  { %v76_v34 = vld [vmem:[#allocation2] sm:$0xff] }
 0x149   :  { %177 = vmatmul.mubr.msk.bf16.vlgmr.msra.gmra.mrb[0].mxu0 %vm28_vm0, %v76_v34 }
 0x21c   :  { %v138_v36 = vpop.f32.mrb[0].mxu0 }
 0x21d   :  { %v139_v37 = vadd.f32 %v165_v35, %v138_v36  ;;  %v178_v38 = vpop.f32.mrb[1].mxu0 }
 0x21e   :  { %v141_v39 = vpop.f32.mrb[2].mxu0 }
 0x21f   :  { %145 = vst [vmem:[#allocation3] sm:$0xff] %v139_v37  ;;  %v142_v40 = vadd.f32 %v165_v35, %v141_v39  ;;  %v179_v41 = vpop.f32.mrb[3].mxu0 }
 0x221   :  { %146 = vst [vmem:[#allocation3 + $0x8] sm:$0xff] %v142_v40 }
 0x222   :  { %202 = shalt.err (!%p199_p4)
}
 0x223   :  { %s203_s7 = scalar_lea.hbm %s294_s5, 256 }
 0x224   :  { %p204_p5 = scmp.ne.s32.totalorder %s294_s5, %s203_s7  ;;  %p207_p6 = scmp.lt.u32.totalorder %s203_s7, %s294_s5 }
 0x226   :  { %p209_p7 = pnand %p207_p6, %p204_p5 }
 0x228   :  { %212 = shalt.err (!%p209_p7)
}
 0x229   :  { %s218_s12 = smov 128   ;;  %s219_s13 = smov 8  }
 0x22a   :  { %158 = dma.vmem_to_hbm [thread:$0]  %s153_s30, 256, %s294_s5, [#allocation4], %s218_s12, %s218_s12, %s219_s13  }
 0x22b   :  { %213 = dma.done.wait [#allocation4], 256  }
 0x22c   :  { %214 = vsyncadd [#allocation4], 4294967040 }
 0x22d   :  { %162 = vsyncpa [#allocation4], 1 }

</bundles_post_ra>
